<compile_context>
chip_gen: v7x
topology: tpu7x:2x2x1
jax: 0.10.0
libtpu: 0.0.40
codegen_flags: <defaults>
</compile_context>

<pallas_src>
import functools

import numpy as np
import jax
import jax.numpy as jnp
from jax import lax
from jax.experimental import pallas as pl
from jax.experimental.pallas import tpu as pltpu

PATCH = 6
NEG_SLOPE = 0.2
C1, C2 = 64, 128                  # conv1 / conv2 output channels
POS1 = PATCH * PATCH              # 36 conv1 output positions per patch
MAX_TILE_PATCHES = 1024           # cap on patches per grid step


def _round_up(x, m):
    return (x + m - 1) // m * m


def _cdiv(a, b):
    return -(-a // b)


def _lrelu(x):
    return jnp.where(x >= 0.0, x, NEG_SLOPE * x)


@functools.lru_cache(maxsize=1)
def _use_fused_ox01():
    """True on 256-wide-MXU chips (v6e/v7x and newer): fuse conv2 ox=0/ox=1."""
    try:
        kind = jax.devices()[0].device_kind.lower()
    except Exception:
        return True
    for old in ("v2", "v3", "v4", "v5"):
        if old in kind:
            return False
    return True


# ------------------------------ fused kernel --------------------------------

def _make_disc_kernel(fuse_ox01):
    def _conv1(x_ref, m1_ref, y1_ref):
        # conv1 (1->64, k3, s1, p1) + LeakyReLU: one bf16 MXU matmul (f32 acc),
        # result stored bf16 in VMEM scratch (lane order: (position, channel)).
        y1 = jnp.dot(x_ref[...], m1_ref[...], preferred_element_type=jnp.float32)
        y1_ref[...] = _lrelu(y1).astype(y1_ref.dtype)

    if fuse_ox01:
        def kernel(x_ref, m1_ref, w2f_ref, w2_ref, w3_ref, o_ref, y1_ref):
            t = x_ref.shape[0]
            _conv1(x_ref, m1_ref, y1_ref)

            acc_pair = None     # (t, 2*C2) f32 conv3 accumulator for ox in {0,1}
            acc_last = None     # (t, C2)   f32 conv3 accumulator for ox == 2
            for oy in range(3):
                pacc = None     # fused (ox=0, ox=1) conv2 accumulator (t, 256)
                lacc = None     # ox=2 conv2 accumulator (t, 128)
                for ky in range(3):
                    iy = 2 * oy - 1 + ky
                    if iy < 0 or iy >= PATCH:
                        continue            # zero-padding row contributes 0
                    # ox=0 + ox=1 fused: contiguous ix window 0..3 (K=256, N=256).
                    srcp = (iy * PATCH) * C1
                    d = jnp.dot(y1_ref[:, srcp:srcp + 4 * C1],
                                w2f_ref[ky * 4 * C1:(ky + 1) * 4 * C1, :],
                                preferred_element_type=jnp.float32)
                    pacc = d if pacc is None else pacc + d
                    # ox=2: ix window 3..5 (K=192, N=128), dense w2 rows kx=0..2.
                    srcl = (iy * PATCH + 3) * C1
                    wrow = (ky * 3) * C1
                    d2 = jnp.dot(y1_ref[:, srcl:srcl + 3 * C1],
                                 w2_ref[wrow:wrow + 3 * C1, :],
                                 preferred_element_type=jnp.float32)
                    lacc = d2 if lacc is None else lacc + d2
                # LeakyReLU + conv3 (Cout=1): VPU multiply into vector accumulators.
                o2 = oy * 3
                cp = _lrelu(pacc) * w3_ref[:, o2 * C2:(o2 + 2) * C2]
                cl = _lrelu(lacc) * w3_ref[:, (o2 + 2) * C2:(o2 + 3) * C2]
                acc_pair = cp if acc_pair is None else acc_pair + cp
                acc_last = cl if acc_last is None else acc_last + cl

            tile_sum = jnp.sum(acc_pair) + jnp.sum(acc_last)
            # Lane-dense (8,128) replicated store -> unmasked vst, tiles independent.
            o_ref[...] = jnp.full(o_ref.shape, tile_sum, o_ref.dtype)
        return kernel

    def kernel(x_ref, m1_ref, w2_ref, w3_ref, o_ref, y1_ref):
        t = x_ref.shape[0]
        _conv1(x_ref, m1_ref, y1_ref)

        acc_vec = None          # (t, C2) f32 conv3 accumulator
        for oy in range(3):
            for ox in range(3):
                kx0 = 1 if ox == 0 else 0     # kx=0 hits zero padding at ox==0
                ix0 = 2 * ox - 1 + kx0
                width = (3 - kx0) * C1        # 128 or 192 wide contraction
                acc = None
                for ky in range(3):
                    iy = 2 * oy - 1 + ky
                    if iy < 0 or iy >= PATCH:
                        continue              # zero-padding row contributes 0
                    src = (iy * PATCH + ix0) * C1
                    wrow = (ky * 3 + kx0) * C1
                    d = jnp.dot(y1_ref[:, src:src + width],
                                w2_ref[wrow:wrow + width, :],
                                preferred_element_type=jnp.float32)
                    acc = d if acc is None else acc + d
                o2 = oy * 3 + ox
                c = _lrelu(acc) * w3_ref[:, o2 * C2:(o2 + 1) * C2]
                acc_vec = c if acc_vec is None else acc_vec + c

        tile_sum = jnp.sum(acc_vec)
        o_ref[...] = jnp.full(o_ref.shape, tile_sum, o_ref.dtype)
    return kernel


def _fused_partial_sums(x2d_bf16, m1, w2f, w2m, w3row, fuse_ox01):
    n = x2d_bf16.shape[0]
    # Spread the tail padding across tiles instead of padding up to a fixed
    # mega-tile (waste capped at <16 rows per tile).
    num_tiles = max(1, _cdiv(n, MAX_TILE_PATCHES))
    t = _round_up(_cdiv(n, num_tiles), 16)    # multiple of 16 for bf16 sublanes
    n_pad = num_tiles * t
    if n_pad != n:
        # zero patches produce exactly zero output (bias-free convs, lrelu(0)=0),
        # so the sum is unaffected; the mean divides by the true count outside.
        x2d_bf16 = jnp.pad(x2d_bf16, ((0, n_pad - n), (0, 0)))

    in_specs = [
        pl.BlockSpec((t, POS1), lambda i: (i, 0)),            # raw patches (bf16)
        pl.BlockSpec((POS1, POS1 * C1), lambda i: (0, 0)),    # conv1 matrix (resident)
    ]
    operands = [x2d_bf16, m1]
    if fuse_ox01:
        in_specs.append(pl.BlockSpec((3 * 4 * C1, 2 * C2), lambda i: (0, 0)))
        operands.append(w2f)                                  # fused conv2 (ox=0,1)
    in_specs += [
        pl.BlockSpec((9 * C1, C2), lambda i: (0, 0)),         # conv2 weights (resident)
        pl.BlockSpec((1, 9 * C2), lambda i: (0, 0)),          # conv3 weights (resident)
    ]
    operands += [w2m, w3row]

    out = pl.pallas_call(
        _make_disc_kernel(fuse_ox01),
        out_shape=jax.ShapeDtypeStruct((num_tiles, 8, 128), jnp.float32),
        grid_spec=pltpu.PrefetchScalarGridSpec(
            num_scalar_prefetch=0,
            grid=(num_tiles,),
            in_specs=in_specs,
            out_specs=pl.BlockSpec((1, 8, 128), lambda i: (i, 0, 0)),
            scratch_shapes=[pltpu.VMEM((t, POS1 * C1), jnp.bfloat16)],
        ),
        compiler_params=pltpu.CompilerParams(
            dimension_semantics=("parallel",)),
    )(*operands)
    return out[:, 0, 0]                        # one partial sum per tile


# --------------------------- weight re-layout glue ---------------------------

def _conv1_as_matrix(w1_oihw):
    """Conv2d(1,64,3,s=1,p=1) on a 6x6 patch as a dense (36, 36*64) bf16 matrix."""
    w1 = jnp.transpose(w1_oihw, (2, 3, 1, 0)).reshape(9, C1)    # (ky*3+kx, cout)
    sel = np.zeros((POS1, POS1, 9), np.float32)                 # (input pos, out pos, tap)
    for oy in range(PATCH):
        for ox in range(PATCH):
            for ky in range(3):
                for kx in range(3):
                    iy, ix = oy - 1 + ky, ox - 1 + kx
                    if 0 <= iy < PATCH and 0 <= ix < PATCH:
                        sel[iy * PATCH + ix, oy * PATCH + ox, ky * 3 + kx] = 1.0
    m1 = jnp.einsum('pok,kc->poc', jnp.asarray(sel), w1,
                    precision=lax.Precision.HIGHEST)
    return m1.reshape(POS1, POS1 * C1).astype(jnp.bfloat16)


def _conv2_as_matrix(w2_oihw):
    """PyTorch OIHW (128,64,3,3) -> (9*64, 128) bf16, row order (ky, kx, cin)."""
    return jnp.transpose(w2_oihw, (2, 3, 1, 0)).reshape(9 * C1, C2).astype(jnp.bfloat16)


def _conv2_fused_matrix(w2_oihw):
    """Fused ox=0/ox=1 conv2 weights: (3*4*64, 2*128) bf16, rows (ky, ix, cin).

    Column block 0..127 = output ox=0 (tap kx = ix+1), 128..255 = ox=1
    (tap kx = ix-1); rows where a tap falls outside the 3x3 kernel are zero.
    """
    w2 = jnp.transpose(w2_oihw, (2, 3, 1, 0))                   # (ky, kx, cin, cout)
    blocks = []
    for ky in range(3):
        blk = jnp.zeros((4 * C1, 2 * C2), jnp.float32)
        for ix in range(4):
            kx = ix + 1                                         # ox = 0
            if kx < 3:
                blk = blk.at[ix * C1:(ix + 1) * C1, 0:C2].set(w2[ky, kx])
            kx = ix - 1                                         # ox = 1
            if kx >= 0:
                blk = blk.at[ix * C1:(ix + 1) * C1, C2:2 * C2].set(w2[ky, kx])
        blocks.append(blk)
    return jnp.concatenate(blocks, axis=0).astype(jnp.bfloat16)


def _conv3_as_row(w3_oihw):
    """PyTorch OIHW (1,128,3,3) -> (1, 9*128) f32, lane order (position, cin)."""
    return jnp.transpose(w3_oihw[0], (1, 2, 0)).reshape(1, 9 * C2).astype(jnp.float32)


@functools.partial(jax.jit, static_argnames=("fuse_ox01",))
def _alr_forward_impl(fake_data, w1_oihw, w2_oihw, w3_oihw, fuse_ox01):
    x2d = fake_data.reshape(-1, POS1).astype(jnp.bfloat16)       # (N, 36) bf16
    n = x2d.shape[0]
    m1 = _conv1_as_matrix(w1_oihw)
    w2m = _conv2_as_matrix(w2_oihw)
    w3row = _conv3_as_row(w3_oihw)
    w2f = _conv2_fused_matrix(w2_oihw) if fuse_ox01 else None
    psums = _fused_partial_sums(x2d, m1, w2f, w2m, w3row, fuse_ox01)
    return -jnp.sum(psums) / jnp.float32(n)


def alr_forward(fake_data, w1_oihw, w2_oihw, w3_oihw):
    """ALR.forward: reg = -mean(Discriminator(fake_data.reshape(-1,1,6,6)))."""
    return _alr_forward_impl(fake_data, w1_oihw, w2_oihw, w3_oihw,
                             fuse_ox01=_use_fused_ox01())


# ------------------------- pure-JAX reference check --------------------------

def alr_reference(fake_data, w1_oihw, w2_oihw, w3_oihw):
    x = fake_data.reshape(-1, 1, PATCH, PATCH).astype(jnp.float32)

    def conv(x, w, stride, pad):
        dn = lax.conv_dimension_numbers(x.shape, w.shape, ('NCHW', 'OIHW', 'NCHW'))
        return lax.conv_general_dilated(
            x, w, (stride, stride), [(pad, pad), (pad, pad)],
            dimension_numbers=dn, precision=lax.Precision.HIGHEST)

    y = conv(x, w1_oihw, 1, 1)
    y = jnp.where(y >= 0.0, y, NEG_SLOPE * y)
    y = conv(y, w2_oihw, 2, 1)
    y = jnp.where(y >= 0.0, y, NEG_SLOPE * y)
    y = conv(y, w3_oihw, 2, 0)
    return -jnp.mean(y.reshape(-1))


# --------------------------------- main --------------------------------------

if __name__ == "__main__":
    key = jax.random.PRNGKey(0)
    k1, k2, k3, kx1, kx2, kx3 = jax.random.split(key, 6)

    # Deterministic synthetic Discriminator weights (PyTorch OIHW conv layout).
    w1_oihw = 0.1 * jax.random.normal(k1, (C1, 1, 3, 3), jnp.float32)
    w2_oihw = 0.1 * jax.random.normal(k2, (C2, C1, 3, 3), jnp.float32)
    w3_oihw = 0.1 * jax.random.normal(k3, (1, C2, 3, 3), jnp.float32)

    # ALR reshapes any input whose element count is a multiple of 36.
    fake_small = jax.random.normal(kx1, (2, 4, PATCH, PATCH), jnp.float32)   # 8 patches
    fake_big = jax.random.normal(kx2, (520, PATCH * PATCH), jnp.float32)     # 520 patches
    fake_multi = jax.random.normal(kx3, (2500, PATCH * PATCH), jnp.float32)  # 3 grid tiles

    for fake in (fake_small, fake_big, fake_multi):
        reg = jax.block_until_ready(alr_forward(fake, w1_oihw, w2_oihw, w3_oihw))
        ref = alr_reference(fake, w1_oihw, w2_oihw, w3_oihw)
        assert bool(jnp.isfinite(reg)), "non-finite result"
        # bf16 MXU operands vs the HIGHEST-precision f32 reference.
        assert abs(float(reg) - float(ref)) < 3e-2 * max(1.0, abs(float(ref))), (
            fake.shape, float(reg), float(ref))

    print("KERNEL_OK")
</pallas_src>

<mosaic_0001>
module attributes {stable_mosaic.version = 11 : i64} {
  func.func @kernel(%arg0: i32, %arg1: memref<16x36xbf16, #tpu.memory_space<vmem>>, %arg2: memref<36x2304xbf16, #tpu.memory_space<vmem>>, %arg3: memref<768x256xbf16, #tpu.memory_space<vmem>>, %arg4: memref<576x128xbf16, #tpu.memory_space<vmem>>, %arg5: memref<1x1152xf32, #tpu.memory_space<vmem>>, %arg6: memref<1x8x128xf32, #tpu.memory_space<vmem>>, %arg7: memref<16x2304xbf16, #tpu.memory_space<vmem>>) attributes {dimension_semantics = [#tpu.dimension_semantics<parallel>], iteration_bounds = array<i64: 1>, scalar_prefetch = 0 : i64, scratch_operands = 1 : i64, tpu.core_type = #tpu.core_type<tc>, window_params = [{transform_indices = @transform_0, window_bounds = array<i64: 16, 36>}, {pipeline_mode = #tpu.pipeline_mode<synchronous>, transform_indices = @transform_1, window_bounds = array<i64: 36, 2304>}, {pipeline_mode = #tpu.pipeline_mode<synchronous>, transform_indices = @transform_2, window_bounds = array<i64: 768, 256>}, {pipeline_mode = #tpu.pipeline_mode<synchronous>, transform_indices = @transform_3, window_bounds = array<i64: 576, 128>}, {pipeline_mode = #tpu.pipeline_mode<synchronous>, transform_indices = @transform_4, window_bounds = array<i64: 1, 1152>}, {transform_indices = @transform_5, window_bounds = array<i64: 1, 8, 128>}]} {
    %c0 = arith.constant 0 : index
    %c0_0 = arith.constant 0 : index
    %0 = vector.load %arg1[%c0, %c0_0] : memref<16x36xbf16, #tpu.memory_space<vmem>>, vector<16x36xbf16>
    %c0_1 = arith.constant 0 : index
    %c0_2 = arith.constant 0 : index
    %1 = vector.load %arg2[%c0_1, %c0_2] : memref<36x2304xbf16, #tpu.memory_space<vmem>>, vector<36x2304xbf16>
    %cst = arith.constant dense<0.000000e+00> : vector<16x2304xf32>
    %2 = tpu.matmul %0, %1, %cst {dimension_numbers = #tpu.dot_dimension_numbers<[1], [0], [0], [1], [0, 0, 1, 1], [], []>} : vector<16x36xbf16>, vector<36x2304xbf16>, vector<16x2304xf32> -> vector<16x2304xf32>
    %cst_3 = arith.constant 0.000000e+00 : f32
    %3 = vector.broadcast %cst_3 : f32 to vector<16x2304xf32>
    %4 = arith.cmpf oge, %2, %3 : vector<16x2304xf32>
    %cst_4 = arith.constant 2.000000e-01 : f32
    %5 = vector.broadcast %cst_4 : f32 to vector<16x2304xf32>
    %6 = arith.mulf %5, %2 : vector<16x2304xf32>
    %7 = arith.select %4, %2, %6 : vector<16x2304xi1>, vector<16x2304xf32>
    %8 = arith.truncf %7 : vector<16x2304xf32> to vector<16x2304xbf16>
    %c0_5 = arith.constant 0 : index
    %c0_6 = arith.constant 0 : index
    %9 = vector.load %arg7[%c0_5, %c0_6] : memref<16x2304xbf16, #tpu.memory_space<vmem>>, vector<16x2304xbf16>
    tpu.vector_store %arg7[%c0_5, %c0_6], %8 {strides = array<i32>} : memref<16x2304xbf16, #tpu.memory_space<vmem>>, vector<16x2304xbf16>,
    %c0_7 = arith.constant 0 : index
    %c0_8 = arith.constant 0 : index
    %10 = vector.load %arg7[%c0_7, %c0_8] : memref<16x2304xbf16, #tpu.memory_space<vmem>>, vector<16x256xbf16>
    %c256 = arith.constant 256 : index
    %c0_9 = arith.constant 0 : index
    %11 = vector.load %arg3[%c256, %c0_9] : memref<768x256xbf16, #tpu.memory_space<vmem>>, vector<256x256xbf16>
    %cst_10 = arith.constant dense<0.000000e+00> : vector<16x256xf32>
    %12 = tpu.matmul %10, %11, %cst_10 {dimension_numbers = #tpu.dot_dimension_numbers<[1], [0], [0], [1], [0, 0, 1, 1], [], []>} : vector<16x256xbf16>, vector<256x256xbf16>, vector<16x256xf32> -> vector<16x256xf32>
    %c0_11 = arith.constant 0 : index
    %c192 = arith.constant 192 : index
    %13 = vector.load %arg7[%c0_11, %c192] : memref<16x2304xbf16, #tpu.memory_space<vmem>>, vector<16x192xbf16>
    %c192_12 = arith.constant 192 : index
    %c0_13 = arith.constant 0 : index
    %14 = vector.load %arg4[%c192_12, %c0_13] : memref<576x128xbf16, #tpu.memory_space<vmem>>, vector<192x128xbf16>
    %cst_14 = arith.constant dense<0.000000e+00> : vector<16x128xf32>
    %15 = tpu.matmul %13, %14, %cst_14 {dimension_numbers = #tpu.dot_dimension_numbers<[1], [0], [0], [1], [0, 0, 1, 1], [], []>} : vector<16x192xbf16>, vector<192x128xbf16>, vector<16x128xf32> -> vector<16x128xf32>
    %c0_15 = arith.constant 0 : index
    %c384 = arith.constant 384 : index
    %16 = vector.load %arg7[%c0_15, %c384] : memref<16x2304xbf16, #tpu.memory_space<vmem>>, vector<16x256xbf16>
    %c512 = arith.constant 512 : index
    %c0_16 = arith.constant 0 : index
    %17 = vector.load %arg3[%c512, %c0_16] : memref<768x256xbf16, #tpu.memory_space<vmem>>, vector<256x256xbf16>
    %cst_17 = arith.constant dense<0.000000e+00> : vector<16x256xf32>
    %18 = tpu.matmul %16, %17, %cst_17 {dimension_numbers = #tpu.dot_dimension_numbers<[1], [0], [0], [1], [0, 0, 1, 1], [], []>} : vector<16x256xbf16>, vector<256x256xbf16>, vector<16x256xf32> -> vector<16x256xf32>
    %19 = arith.addf %12, %18 : vector<16x256xf32>
    %c0_18 = arith.constant 0 : index
    %c576 = arith.constant 576 : index
    %20 = vector.load %arg7[%c0_18, %c576] : memref<16x2304xbf16, #tpu.memory_space<vmem>>, vector<16x192xbf16>
    %c384_19 = arith.constant 384 : index
    %c0_20 = arith.constant 0 : index
    %21 = vector.load %arg4[%c384_19, %c0_20] : memref<576x128xbf16, #tpu.memory_space<vmem>>, vector<192x128xbf16>
    %cst_21 = arith.constant dense<0.000000e+00> : vector<16x128xf32>
    %22 = tpu.matmul %20, %21, %cst_21 {dimension_numbers = #tpu.dot_dimension_numbers<[1], [0], [0], [1], [0, 0, 1, 1], [], []>} : vector<16x192xbf16>, vector<192x128xbf16>, vector<16x128xf32> -> vector<16x128xf32>
    %23 = arith.addf %15, %22 : vector<16x128xf32>
    %cst_22 = arith.constant 0.000000e+00 : f32
    %24 = vector.broadcast %cst_22 : f32 to vector<16x256xf32>
    %25 = arith.cmpf oge, %19, %24 : vector<16x256xf32>
    %cst_23 = arith.constant 2.000000e-01 : f32
    %26 = vector.broadcast %cst_23 : f32 to vector<16x256xf32>
    %27 = arith.mulf %26, %19 : vector<16x256xf32>
    %28 = arith.select %25, %19, %27 : vector<16x256xi1>, vector<16x256xf32>
    %c0_24 = arith.constant 0 : index
    %c0_25 = arith.constant 0 : index
    %29 = vector.load %arg5[%c0_24, %c0_25] : memref<1x1152xf32, #tpu.memory_space<vmem>>, vector<1x256xf32>
    %30 = vector.broadcast %29 : vector<1x256xf32> to vector<16x256xf32>
    %31 = arith.mulf %28, %30 : vector<16x256xf32>
    %cst_26 = arith.constant 0.000000e+00 : f32
    %32 = vector.broadcast %cst_26 : f32 to vector<16x128xf32>
    %33 = arith.cmpf oge, %23, %32 : vector<16x128xf32>
    %cst_27 = arith.constant 2.000000e-01 : f32
    %34 = vector.broadcast %cst_27 : f32 to vector<16x128xf32>
    %35 = arith.mulf %34, %23 : vector<16x128xf32>
    %36 = arith.select %33, %23, %35 : vector<16x128xi1>, vector<16x128xf32>
    %c0_28 = arith.constant 0 : index
    %c256_29 = arith.constant 256 : index
    %37 = vector.load %arg5[%c0_28, %c256_29] : memref<1x1152xf32, #tpu.memory_space<vmem>>, vector<1x128xf32>
    %38 = vector.broadcast %37 : vector<1x128xf32> to vector<16x128xf32>
    %39 = arith.mulf %36, %38 : vector<16x128xf32>
    %c0_30 = arith.constant 0 : index
    %c384_31 = arith.constant 384 : index
    %40 = vector.load %arg7[%c0_30, %c384_31] : memref<16x2304xbf16, #tpu.memory_space<vmem>>, vector<16x256xbf16>
    %c0_32 = arith.constant 0 : index
    %c0_33 = arith.constant 0 : index
    %41 = vector.load %arg3[%c0_32, %c0_33] : memref<768x256xbf16, #tpu.memory_space<vmem>>, vector<256x256xbf16>
    %cst_34 = arith.constant dense<0.000000e+00> : vector<16x256xf32>
    %42 = tpu.matmul %40, %41, %cst_34 {dimension_numbers = #tpu.dot_dimension_numbers<[1], [0], [0], [1], [0, 0, 1, 1], [], []>} : vector<16x256xbf16>, vector<256x256xbf16>, vector<16x256xf32> -> vector<16x256xf32>
    %c0_35 = arith.constant 0 : index
    %c576_36 = arith.constant 576 : index
    %43 = vector.load %arg7[%c0_35, %c576_36] : memref<16x2304xbf16, #tpu.memory_space<vmem>>, vector<16x192xbf16>
    %c0_37 = arith.constant 0 : index
    %c0_38 = arith.constant 0 : index
    %44 = vector.load %arg4[%c0_37, %c0_38] : memref<576x128xbf16, #tpu.memory_space<vmem>>, vector<192x128xbf16>
    %cst_39 = arith.constant dense<0.000000e+00> : vector<16x128xf32>
    %45 = tpu.matmul %43, %44, %cst_39 {dimension_numbers = #tpu.dot_dimension_numbers<[1], [0], [0], [1], [0, 0, 1, 1], [], []>} : vector<16x192xbf16>, vector<192x128xbf16>, vector<16x128xf32> -> vector<16x128xf32>
    %c0_40 = arith.constant 0 : index
    %c768 = arith.constant 768 : index
    %46 = vector.load %arg7[%c0_40, %c768] : memref<16x2304xbf16, #tpu.memory_space<vmem>>, vector<16x256xbf16>
    %c256_41 = arith.constant 256 : index
    %c0_42 = arith.constant 0 : index
    %47 = vector.load %arg3[%c256_41, %c0_42] : memref<768x256xbf16, #tpu.memory_space<vmem>>, vector<256x256xbf16>
    %cst_43 = arith.constant dense<0.000000e+00> : vector<16x256xf32>
    %48 = tpu.matmul %46, %47, %cst_43 {dimension_numbers = #tpu.dot_dimension_numbers<[1], [0], [0], [1], [0, 0, 1, 1], [], []>} : vector<16x256xbf16>, vector<256x256xbf16>, vector<16x256xf32> -> vector<16x256xf32>
    %49 = arith.addf %42, %48 : vector<16x256xf32>
    %c0_44 = arith.constant 0 : index
    %c960 = arith.constant 960 : index
    %50 = vector.load %arg7[%c0_44, %c960] : memref<16x2304xbf16, #tpu.memory_space<vmem>>, vector<16x192xbf16>
    %c192_45 = arith.constant 192 : index
    %c0_46 = arith.constant 0 : index
    %51 = vector.load %arg4[%c192_45, %c0_46] : memref<576x128xbf16, #tpu.memory_space<vmem>>, vector<192x128xbf16>
    %cst_47 = arith.constant dense<0.000000e+00> : vector<16x128xf32>
    %52 = tpu.matmul %50, %51, %cst_47 {dimension_numbers = #tpu.dot_dimension_numbers<[1], [0], [0], [1], [0, 0, 1, 1], [], []>} : vector<16x192xbf16>, vector<192x128xbf16>, vector<16x128xf32> -> vector<16x128xf32>
    %53 = arith.addf %45, %52 : vector<16x128xf32>
    %c0_48 = arith.constant 0 : index
    %c1152 = arith.constant 1152 : index
    %54 = vector.load %arg7[%c0_48, %c1152] : memref<16x2304xbf16, #tpu.memory_space<vmem>>, vector<16x256xbf16>
    %c512_49 = arith.constant 512 : index
    %c0_50 = arith.constant 0 : index
    %55 = vector.load %arg3[%c512_49, %c0_50] : memref<768x256xbf16, #tpu.memory_space<vmem>>, vector<256x256xbf16>
    %cst_51 = arith.constant dense<0.000000e+00> : vector<16x256xf32>
    %56 = tpu.matmul %54, %55, %cst_51 {dimension_numbers = #tpu.dot_dimension_numbers<[1], [0], [0], [1], [0, 0, 1, 1], [], []>} : vector<16x256xbf16>, vector<256x256xbf16>, vector<16x256xf32> -> vector<16x256xf32>
    %57 = arith.addf %49, %56 : vector<16x256xf32>
    %c0_52 = arith.constant 0 : index
    %c1344 = arith.constant 1344 : index
    %58 = vector.load %arg7[%c0_52, %c1344] : memref<16x2304xbf16, #tpu.memory_space<vmem>>, vector<16x192xbf16>
    %c384_53 = arith.constant 384 : index
    %c0_54 = arith.constant 0 : index
    %59 = vector.load %arg4[%c384_53, %c0_54] : memref<576x128xbf16, #tpu.memory_space<vmem>>, vector<192x128xbf16>
    %cst_55 = arith.constant dense<0.000000e+00> : vector<16x128xf32>
    %60 = tpu.matmul %58, %59, %cst_55 {dimension_numbers = #tpu.dot_dimension_numbers<[1], [0], [0], [1], [0, 0, 1, 1], [], []>} : vector<16x192xbf16>, vector<192x128xbf16>, vector<16x128xf32> -> vector<16x128xf32>
    %61 = arith.addf %53, %60 : vector<16x128xf32>
    %cst_56 = arith.constant 0.000000e+00 : f32
    %62 = vector.broadcast %cst_56 : f32 to vector<16x256xf32>
    %63 = arith.cmpf oge, %57, %62 : vector<16x256xf32>
    %cst_57 = arith.constant 2.000000e-01 : f32
    %64 = vector.broadcast %cst_57 : f32 to vector<16x256xf32>
    %65 = arith.mulf %64, %57 : vector<16x256xf32>
    %66 = arith.select %63, %57, %65 : vector<16x256xi1>, vector<16x256xf32>
    %c0_58 = arith.constant 0 : index
    %c384_59 = arith.constant 384 : index
    %67 = vector.load %arg5[%c0_58, %c384_59] : memref<1x1152xf32, #tpu.memory_space<vmem>>, vector<1x256xf32>
    %68 = vector.broadcast %67 : vector<1x256xf32> to vector<16x256xf32>
    %69 = arith.mulf %66, %68 : vector<16x256xf32>
    %cst_60 = arith.constant 0.000000e+00 : f32
    %70 = vector.broadcast %cst_60 : f32 to vector<16x128xf32>
    %71 = arith.cmpf oge, %61, %70 : vector<16x128xf32>
    %cst_61 = arith.constant 2.000000e-01 : f32
    %72 = vector.broadcast %cst_61 : f32 to vector<16x128xf32>
    %73 = arith.mulf %72, %61 : vector<16x128xf32>
    %74 = arith.select %71, %61, %73 : vector<16x128xi1>, vector<16x128xf32>
    %c0_62 = arith.constant 0 : index
    %c640 = arith.constant 640 : index
    %75 = vector.load %arg5[%c0_62, %c640] : memref<1x1152xf32, #tpu.memory_space<vmem>>, vector<1x128xf32>
    %76 = vector.broadcast %75 : vector<1x128xf32> to vector<16x128xf32>
    %77 = arith.mulf %74, %76 : vector<16x128xf32>
    %78 = arith.addf %31, %69 : vector<16x256xf32>
    %79 = arith.addf %39, %77 : vector<16x128xf32>
    %c0_63 = arith.constant 0 : index
    %c1152_64 = arith.constant 1152 : index
    %80 = vector.load %arg7[%c0_63, %c1152_64] : memref<16x2304xbf16, #tpu.memory_space<vmem>>, vector<16x256xbf16>
    %c0_65 = arith.constant 0 : index
    %c0_66 = arith.constant 0 : index
    %81 = vector.load %arg3[%c0_65, %c0_66] : memref<768x256xbf16, #tpu.memory_space<vmem>>, vector<256x256xbf16>
    %cst_67 = arith.constant dense<0.000000e+00> : vector<16x256xf32>
    %82 = tpu.matmul %80, %81, %cst_67 {dimension_numbers = #tpu.dot_dimension_numbers<[1], [0], [0], [1], [0, 0, 1, 1], [], []>} : vector<16x256xbf16>, vector<256x256xbf16>, vector<16x256xf32> -> vector<16x256xf32>
    %c0_68 = arith.constant 0 : index
    %c1344_69 = arith.constant 1344 : index
    %83 = vector.load %arg7[%c0_68, %c1344_69] : memref<16x2304xbf16, #tpu.memory_space<vmem>>, vector<16x192xbf16>
    %c0_70 = arith.constant 0 : index
    %c0_71 = arith.constant 0 : index
    %84 = vector.load %arg4[%c0_70, %c0_71] : memref<576x128xbf16, #tpu.memory_space<vmem>>, vector<192x128xbf16>
    %cst_72 = arith.constant dense<0.000000e+00> : vector<16x128xf32>
    %85 = tpu.matmul %83, %84, %cst_72 {dimension_numbers = #tpu.dot_dimension_numbers<[1], [0], [0], [1], [0, 0, 1, 1], [], []>} : vector<16x192xbf16>, vector<192x128xbf16>, vector<16x128xf32> -> vector<16x128xf32>
    %c0_73 = arith.constant 0 : index
    %c1536 = arith.constant 1536 : index
    %86 = vector.load %arg7[%c0_73, %c1536] : memref<16x2304xbf16, #tpu.memory_space<vmem>>, vector<16x256xbf16>
    %c256_74 = arith.constant 256 : index
    %c0_75 = arith.constant 0 : index
    %87 = vector.load %arg3[%c256_74, %c0_75] : memref<768x256xbf16, #tpu.memory_space<vmem>>, vector<256x256xbf16>
    %cst_76 = arith.constant dense<0.000000e+00> : vector<16x256xf32>
    %88 = tpu.matmul %86, %87, %cst_76 {dimension_numbers = #tpu.dot_dimension_numbers<[1], [0], [0], [1], [0, 0, 1, 1], [], []>} : vector<16x256xbf16>, vector<256x256xbf16>, vector<16x256xf32> -> vector<16x256xf32>
    %89 = arith.addf %82, %88 : vector<16x256xf32>
    %c0_77 = arith.constant 0 : index
    %c1728 = arith.constant 1728 : index
    %90 = vector.load %arg7[%c0_77, %c1728] : memref<16x2304xbf16, #tpu.memory_space<vmem>>, vector<16x192xbf16>
    %c192_78 = arith.constant 192 : index
    %c0_79 = arith.constant 0 : index
    %91 = vector.load %arg4[%c192_78, %c0_79] : memref<576x128xbf16, #tpu.memory_space<vmem>>, vector<192x128xbf16>
    %cst_80 = arith.constant dense<0.000000e+00> : vector<16x128xf32>
    %92 = tpu.matmul %90, %91, %cst_80 {dimension_numbers = #tpu.dot_dimension_numbers<[1], [0], [0], [1], [0, 0, 1, 1], [], []>} : vector<16x192xbf16>, vector<192x128xbf16>, vector<16x128xf32> -> vector<16x128xf32>
    %93 = arith.addf %85, %92 : vector<16x128xf32>
    %c0_81 = arith.constant 0 : index
    %c1920 = arith.constant 1920 : index
    %94 = vector.load %arg7[%c0_81, %c1920] : memref<16x2304xbf16, #tpu.memory_space<vmem>>, vector<16x256xbf16>
    %c512_82 = arith.constant 512 : index
    %c0_83 = arith.constant 0 : index
    %95 = vector.load %arg3[%c512_82, %c0_83] : memref<768x256xbf16, #tpu.memory_space<vmem>>, vector<256x256xbf16>
    %cst_84 = arith.constant dense<0.000000e+00> : vector<16x256xf32>
    %96 = tpu.matmul %94, %95, %cst_84 {dimension_numbers = #tpu.dot_dimension_numbers<[1], [0], [0], [1], [0, 0, 1, 1], [], []>} : vector<16x256xbf16>, vector<256x256xbf16>, vector<16x256xf32> -> vector<16x256xf32>
    %97 = arith.addf %89, %96 : vector<16x256xf32>
    %c0_85 = arith.constant 0 : index
    %c2112 = arith.constant 2112 : index
    %98 = vector.load %arg7[%c0_85, %c2112] : memref<16x2304xbf16, #tpu.memory_space<vmem>>, vector<16x192xbf16>
    %c384_86 = arith.constant 384 : index
    %c0_87 = arith.constant 0 : index
    %99 = vector.load %arg4[%c384_86, %c0_87] : memref<576x128xbf16, #tpu.memory_space<vmem>>, vector<192x128xbf16>
    %cst_88 = arith.constant dense<0.000000e+00> : vector<16x128xf32>
    %100 = tpu.matmul %98, %99, %cst_88 {dimension_numbers = #tpu.dot_dimension_numbers<[1], [0], [0], [1], [0, 0, 1, 1], [], []>} : vector<16x192xbf16>, vector<192x128xbf16>, vector<16x128xf32> -> vector<16x128xf32>
    %101 = arith.addf %93, %100 : vector<16x128xf32>
    %cst_89 = arith.constant 0.000000e+00 : f32
    %102 = vector.broadcast %cst_89 : f32 to vector<16x256xf32>
    %103 = arith.cmpf oge, %97, %102 : vector<16x256xf32>
    %cst_90 = arith.constant 2.000000e-01 : f32
    %104 = vector.broadcast %cst_90 : f32 to vector<16x256xf32>
    %105 = arith.mulf %104, %97 : vector<16x256xf32>
    %106 = arith.select %103, %97, %105 : vector<16x256xi1>, vector<16x256xf32>
    %c0_91 = arith.constant 0 : index
    %c768_92 = arith.constant 768 : index
    %107 = vector.load %arg5[%c0_91, %c768_92] : memref<1x1152xf32, #tpu.memory_space<vmem>>, vector<1x256xf32>
    %108 = vector.broadcast %107 : vector<1x256xf32> to vector<16x256xf32>
    %109 = arith.mulf %106, %108 : vector<16x256xf32>
    %cst_93 = arith.constant 0.000000e+00 : f32
    %110 = vector.broadcast %cst_93 : f32 to vector<16x128xf32>
    %111 = arith.cmpf oge, %101, %110 : vector<16x128xf32>
    %cst_94 = arith.constant 2.000000e-01 : f32
    %112 = vector.broadcast %cst_94 : f32 to vector<16x128xf32>
    %113 = arith.mulf %112, %101 : vector<16x128xf32>
    %114 = arith.select %111, %101, %113 : vector<16x128xi1>, vector<16x128xf32>
    %c0_95 = arith.constant 0 : index
    %c1024 = arith.constant 1024 : index
    %115 = vector.load %arg5[%c0_95, %c1024] : memref<1x1152xf32, #tpu.memory_space<vmem>>, vector<1x128xf32>
    %116 = vector.broadcast %115 : vector<1x128xf32> to vector<16x128xf32>
    %117 = arith.mulf %114, %116 : vector<16x128xf32>
    %118 = arith.addf %78, %109 : vector<16x256xf32>
    %119 = arith.addf %79, %117 : vector<16x128xf32>
    %120 = vector.shape_cast %118 : vector<16x256xf32> to vector<1x16x256xf32>
    %cst_96 = arith.constant dense<0.000000e+00> : vector<1xf32>
    %121 = vector.multi_reduction <add>, %120, %cst_96 [1, 2] : vector<1x16x256xf32> to vector<1xf32>
    %122 = vector.shape_cast %121 : vector<1xf32> to vector<1x1x1xf32>
    %123 = vector.extract %122[0, 0, 0] : f32 from vector<1x1x1xf32>
    %124 = vector.shape_cast %119 : vector<16x128xf32> to vector<1x16x128xf32>
    %cst_97 = arith.constant dense<0.000000e+00> : vector<1xf32>
    %125 = vector.multi_reduction <add>, %124, %cst_97 [1, 2] : vector<1x16x128xf32> to vector<1xf32>
    %126 = vector.shape_cast %125 : vector<1xf32> to vector<1x1x1xf32>
    %127 = vector.extract %126[0, 0, 0] : f32 from vector<1x1x1xf32>
    %128 = arith.addf %123, %127 : f32
    %129 = vector.broadcast %128 : f32 to vector<1x8x128xf32>
    %c0_98 = arith.constant 0 : index
    %c0_99 = arith.constant 0 : index
    %c0_100 = arith.constant 0 : index
    %130 = vector.load %arg6[%c0_98, %c0_99, %c0_100] : memref<1x8x128xf32, #tpu.memory_space<vmem>>, vector<1x8x128xf32>
    tpu.vector_store %arg6[%c0_98, %c0_99, %c0_100], %129 {strides = array<i32>} : memref<1x8x128xf32, #tpu.memory_space<vmem>>, vector<1x8x128xf32>,
    return
  }
  func.func @transform_0(%arg0: i32) -> (i32, i32) {
    %c0_i32 = arith.constant 0 : i32
    %c0_i32_0 = arith.constant 0 : i32
    return %arg0, %c0_i32 : i32, i32
  }
  func.func @transform_1(%arg0: i32) -> (i32, i32) {
    %c0_i32 = arith.constant 0 : i32
    %c0_i32_0 = arith.constant 0 : i32
    %c0_i32_1 = arith.constant 0 : i32
    return %c0_i32, %c0_i32_0 : i32, i32
  }
  func.func @transform_2(%arg0: i32) -> (i32, i32) {
    %c0_i32 = arith.constant 0 : i32
    %c0_i32_0 = arith.constant 0 : i32
    %c0_i32_1 = arith.constant 0 : i32
    return %c0_i32, %c0_i32_0 : i32, i32
  }
  func.func @transform_3(%arg0: i32) -> (i32, i32) {
    %c0_i32 = arith.constant 0 : i32
    %c0_i32_0 = arith.constant 0 : i32
    %c0_i32_1 = arith.constant 0 : i32
    return %c0_i32, %c0_i32_0 : i32, i32
  }
  func.func @transform_4(%arg0: i32) -> (i32, i32) {
    %c0_i32 = arith.constant 0 : i32
    %c0_i32_0 = arith.constant 0 : i32
    %c0_i32_1 = arith.constant 0 : i32
    return %c0_i32, %c0_i32_0 : i32, i32
  }
  func.func @transform_5(%arg0: i32) -> (i32, i32, i32) {
    %c0_i32 = arith.constant 0 : i32
    %c0_i32_0 = arith.constant 0 : i32
    %c0_i32_1 = arith.constant 0 : i32
    return %arg0, %c0_i32, %c0_i32_0 : i32, i32, i32
  }
}

</mosaic_0001>

<bundles_post_ra>
// kernel: _alr_forward_impl.1
= control target key start
LH: loop header
LB: loop body
LE: loop exit
PB: predicated region body
PF: predicated region fallthrough
CT: control target
= control target key end

     0   :  { %v4875_v1 = vmov 0   ;;  %vm302_vm0 = vcmask 1041408   ;;  %vm298_vm1 = vcmask 293888   ;;  %s3258_s12 = smov 64   ;;  %s4849_s1 = inlined_call_operand.vmem [shape: bf16[36,2304], index: 1, kind: input, shape index: {}]   ;;  %s4850_s0 = inlined_call_operand.vmem [shape: bf16[16,36], index: 0, kind: input, shape index: {}]   ;;  %s4851_s2 = inlined_call_operand.vmem [shape: bf16[768,256], index: 2, kind: input, shape index: {}]   ;;  %s4852_s3 = inlined_call_operand.vmem [shape: bf16[576,128], index: 3, kind: input, shape index: {}]   ;;  %s4853_s4 = inlined_call_operand.vmem [shape: f32[1,1152], index: 4, kind: input, shape index: {}]   ;;  %s4854_s5 = inlined_call_operand.vmem [shape: f32[1,8,128], index: 5, kind: output, shape index: {}]  }
   0x1   :  { %v2959_v0 = vld [vmem:[%s4849_s1 + $0x4] ss:$72 sps:$4 sm:$0xff]   ;;  %389 = vmatprep.mubr.bf16.mxu0 %v4875_v1  ;;  %518 = vmatprep.mubr.bf16.mxu1 %v4875_v1  ;;  %v2961_v2 = vld [vmem:[%s4849_s1] ss:$72 sps:$4 sm:$0xff]   ;;  %v2962_v3 = vld [vmem:[%s4849_s1 + $0x94] ss:$72 sps:$4 sm:$0xff]  }
   0x2   :  { %357 = vmatprep.subr.bf16.mxu0 %v2959_v0  ;;  %v59_v4 = vld [vmem:[%s4849_s1 + $0x120] sm:$0x33]  ;;  %v2964_v5 = vld [vmem:[%s4849_s1 + $0x90] ss:$72 sps:$4 sm:$0xff]   ;;  %v2970_v9 = vld [vmem:[%s4849_s1 + $0xc] ss:$72 sps:$4 sm:$0xff]  }
   0x3   :  { %358 = vmatpush1.bf16.msra.mxu0 %v2961_v2  ;;  %v2735_v6 = vcombine.high %v59_v4, %v59_v4  ;;  %v2734_v7 = vcombine.low %v59_v4, %v59_v4  ;;  %v3314_v10 = vld [vmem:[%s4850_s0] sm:$0xff]   ;;  %v2968_v11 = vld [vmem:[%s4849_s1 + $0x8] ss:$72 sps:$4 sm:$0xff]   ;;  %v2990_v16 = vld [vmem:[%s4849_s1 + $0xac] ss:$72 sps:$4 sm:$0xff]  }
   0x4   :  { %359 = vmatprep.subr.bf16.mxu0 %v2962_v3  ;;  %v2984_v12 = vld [vmem:[%s4849_s1 + $0x1c] ss:$72 sps:$4 sm:$0xff]   ;;  %v2986_v13 = vld [vmem:[%s4849_s1 + $0x18] ss:$72 sps:$4 sm:$0xff]   ;;  %v60_v15 = vld [vmem:[%s4849_s1 + $0x128] sm:$0x33] }
   0x5   :  { %v304_v8 = vsel %vm302_vm0, %v2734_v7, 0  ;;  %v2973_v14 = vld [vmem:[%s4849_s1 + $0x9c] ss:$72 sps:$4 sm:$0xff]   ;;  %486 = vmatprep.subr.bf16.mxu1 %v2984_v12  ;;  %v2992_v17 = vld [vmem:[%s4849_s1 + $0xa8] ss:$72 sps:$4 sm:$0xff]   ;;  %v2737_v19 = vcombine.high %v60_v15, %v60_v15  ;;  %v2736_v21 = vcombine.low %v60_v15, %v60_v15 }
   0x6   :  { %487 = vmatpush1.bf16.msra.mxu1 %v2986_v13  ;;  %v2971_v18 = vld [vmem:[%s4849_s1 + $0x98] ss:$72 sps:$4 sm:$0xff]   ;;  %v3002_v25 = vld [vmem:[%s4849_s1 + $0x2c] ss:$72 sps:$4 sm:$0xff]   ;;  %v3000_v29 = vld [vmem:[%s4849_s1 + $0x28] ss:$72 sps:$4 sm:$0xff]  }
   0x7   :  { %360 = vmatpush1.bf16.msra.mxu0 %v2964_v5  ;;  %v62_v20 = vld [vmem:[%s4849_s1 + $0x138] sm:$0x33]  ;;  %488 = vmatprep.subr.bf16.mxu1 %v2990_v16  ;;  %v310_v26 = vsel %vm302_vm0, %v2736_v21, 0  ;;  %v64_v31 = vld [vmem:[%s4849_s1 + $0x148] sm:$0x33] }
   0x8   :  { %2752 = vmatprep.subr.msk.bf16.mxu0 %vm302_vm0, %v2735_v6  ;;  %v2741_v22 = vcombine.high %v62_v20, %v62_v20  ;;  %v2740_v23 = vcombine.low %v62_v20, %v62_v20  ;;  %v2978_v27 = vld [vmem:[%s4849_s1 + $0x14] ss:$72 sps:$4 sm:$0xff]   ;;  %v2976_v28 = vld [vmem:[%s4849_s1 + $0x10] ss:$72 sps:$4 sm:$0xff]   ;;  %v2981_v32 = vld [vmem:[%s4849_s1 + $0xa4] ss:$72 sps:$4 sm:$0xff]   ;;  %v2745_v35 = vcombine.high %v64_v31, %v64_v31  ;;  %v2744_v36 = vcombine.low %v64_v31, %v64_v31 }
   0x9   :  { %v3005_v30 = vld [vmem:[%s4849_s1 + $0xbc] ss:$72 sps:$4 sm:$0xff]   ;;  %v61_v33 = vld [vmem:[%s4849_s1 + $0x130] sm:$0x33]  ;;  %v3003_v34 = vld [vmem:[%s4849_s1 + $0xb8] ss:$72 sps:$4 sm:$0xff]  }
   0xa   :  { %489 = vmatpush1.bf16.msra.mxu1 %v2992_v17  ;;  %v322_v24 = vsel %vm302_vm0, %v2740_v23, 0  ;;  %v2979_v37 = vld [vmem:[%s4849_s1 + $0xa0] ss:$72 sps:$4 sm:$0xff]   ;;  %v2739_v38 = vcombine.high %v61_v33, %v61_v33  ;;  %v2738_v39 = vcombine.low %v61_v33, %v61_v33  ;;  %v334_v40 = vsel %vm302_vm0, %v2744_v36, 0  ;;  %v3010_v41 = vld [vmem:[%s4849_s1 + $0x3c] ss:$72 sps:$4 sm:$0xff]  }
   0xb   :  { %362 = vmatpush1.bf16.msra.mxu0 %v304_v8  ;;  %2758 = vmatprep.subr.msk.bf16.mxu1 %vm302_vm0, %v2741_v22  ;;  %v2989_v42 = vld [vmem:[%s4849_s1 + $0x24] ss:$72 sps:$4 sm:$0xff]   ;;  %v3008_v44 = vld [vmem:[%s4849_s1 + $0x38] ss:$72 sps:$4 sm:$0xff]   ;;  %v2995_v48 = vld [vmem:[%s4849_s1 + $0xb4] ss:$72 sps:$4 sm:$0xff]  }
   0xc   :  { %400 = vmatprep.subr.bf16.mxu0 %v2970_v9  ;;  %v316_v43 = vsel %vm302_vm0, %v2738_v39, 0  ;;  %v3013_v45 = vld [vmem:[%s4849_s1 + $0xcc] ss:$72 sps:$4 sm:$0xff]   ;;  %v2987_v46 = vld [vmem:[%s4849_s1 + $0x20] ss:$72 sps:$4 sm:$0xff]  }
   0xd   :  { %v66_v47 = vld [vmem:[%s4849_s1 + $0x158] sm:$0x33]  ;;  %v63_v49 = vld [vmem:[%s4849_s1 + $0x140] sm:$0x33]  ;;  %v3011_v50 = vld [vmem:[%s4849_s1 + $0xc8] ss:$72 sps:$4 sm:$0xff]  }
   0xe   :  { %2753 = vmatmul.mubr.msk.bf16.vlgmr.msra.gmra.mrb[0].mxu0 %vm298_vm1, %v3314_v10  ;;  %491 = vmatpush1.bf16.msra.mxu1 %v322_v24  ;;  %v2993_v51 = vld [vmem:[%s4849_s1 + $0xb0] ss:$72 sps:$4 sm:$0xff]   ;;  %v2749_v52 = vcombine.high %v66_v47, %v66_v47  ;;  %v2748_v53 = vcombine.low %v66_v47, %v66_v47  ;;  %v2743_v54 = vcombine.high %v63_v49, %v63_v49  ;;  %v3018_v56 = vld [vmem:[%s4851_s2 + $0x204] ss:$8 sps:$4 sm:$0xff]   ;;  %v3016_v58 = vld [vmem:[%s4851_s2 + $0x200] ss:$8 sps:$4 sm:$0xff]  }
   0xf   :  { %401 = vmatpush1.bf16.msra.mxu0 %v2968_v11  ;;  %432 = vmatprep.mubr.bf16.mxu0 %v4875_v1  ;;  %v2742_v55 = vcombine.low %v63_v49, %v63_v49  ;;  %v3021_v60 = vld [vmem:[%s4851_s2 + $0x214] ss:$8 sps:$4 sm:$0xff]   ;;  %v3019_v61 = vld [vmem:[%s4851_s2 + $0x210] ss:$8 sps:$4 sm:$0xff]   ;;  %v3024_v62 = vld [vmem:[%s4851_s2 + $0x224] ss:$8 sps:$4 sm:$0xff]  }
  0x10   :  { %402 = vmatprep.subr.bf16.mxu0 %v2973_v14  ;;  %572 = vmatprep.subr.bf16.mxu1 %v3002_v25  ;;  %v346_v57 = vsel %vm302_vm0, %v2748_v53, 0  ;;  %v3022_v63 = vld [vmem:[%s4851_s2 + $0x220] ss:$8 sps:$4 sm:$0xff]   ;;  %v3027_v0 = vld [vmem:[%s4851_s2 + $0x234] ss:$8 sps:$4 sm:$0xff]  }
  0x11   :  { %2759 = vmatmul.mubr.msk.bf16.vlgmr.msra.gmra.mrb[0].mxu1 %vm298_vm1, %v3314_v10  ;;  %v328_v59 = vsel %vm302_vm0, %v2742_v55, 0  ;;  %v3025_v2 = vld [vmem:[%s4851_s2 + $0x230] ss:$8 sps:$4 sm:$0xff]   ;;  %v3030_v3 = vld [vmem:[%s4851_s2 + $0x244] ss:$8 sps:$4 sm:$0xff]  }
  0x12   :  { %573 = vmatpush1.bf16.msra.mxu1 %v3000_v29  ;;  %604 = vmatprep.mubr.bf16.mxu1 %v4875_v1  ;;  %v3028_v4 = vld [vmem:[%s4851_s2 + $0x240] ss:$8 sps:$4 sm:$0xff]   ;;  %v3033_v5 = vld [vmem:[%s4851_s2 + $0x254] ss:$8 sps:$4 sm:$0xff]   ;;  %v3031_v6 = vld [vmem:[%s4851_s2 + $0x250] ss:$8 sps:$4 sm:$0xff]  }
  0x13   :  { %403 = vmatpush1.bf16.msra.mxu0 %v2971_v18  ;;  %574 = vmatprep.subr.bf16.mxu1 %v3005_v30  ;;  %v3036_v7 = vld [vmem:[%s4851_s2 + $0x264] ss:$8 sps:$4 sm:$0xff]   ;;  %v3034_v8 = vld [vmem:[%s4851_s2 + $0x260] ss:$8 sps:$4 sm:$0xff]   ;;  %v3039_v9 = vld [vmem:[%s4851_s2 + $0x274] ss:$8 sps:$4 sm:$0xff]  }
  0x14   :  { %2754 = vmatprep.subr.msk.bf16.mxu0 %vm302_vm0, %v2737_v19  ;;  %v3037_v11 = vld [vmem:[%s4851_s2 + $0x270] ss:$8 sps:$4 sm:$0xff]   ;;  %v3042_v12 = vld [vmem:[%s4851_s2 + $0x284] ss:$8 sps:$4 sm:$0xff]   ;;  %v3040_v13 = vld [vmem:[%s4851_s2 + $0x280] ss:$8 sps:$4 sm:$0xff]  }
  0x15   :  { %v3045_v14 = vld [vmem:[%s4851_s2 + $0x294] ss:$8 sps:$4 sm:$0xff]   ;;  %v3043_v15 = vld [vmem:[%s4851_s2 + $0x290] ss:$8 sps:$4 sm:$0xff]   ;;  %v3046_v16 = vld [vmem:[%s4851_s2 + $0x2a0] ss:$8 sps:$4 sm:$0xff]  }
  0x16   :  { %575 = vmatpush1.bf16.msra.mxu1 %v3003_v34  ;;  %v3048_v17 = vld [vmem:[%s4851_s2 + $0x2a4] ss:$8 sps:$4 sm:$0xff]   ;;  %v3051_v18 = vld [vmem:[%s4851_s2 + $0x2b4] ss:$8 sps:$4 sm:$0xff]   ;;  %v3049_v19 = vld [vmem:[%s4851_s2 + $0x2b0] ss:$8 sps:$4 sm:$0xff]  }
  0x17   :  { %405 = vmatpush1.bf16.msra.mxu0 %v310_v26  ;;  %2762 = vmatprep.subr.msk.bf16.mxu1 %vm302_vm0, %v2745_v35  ;;  %v3054_v20 = vld [vmem:[%s4851_s2 + $0x2c4] ss:$8 sps:$4 sm:$0xff]   ;;  %v3052_v21 = vld [vmem:[%s4851_s2 + $0x2c0] ss:$8 sps:$4 sm:$0xff]   ;;  %v3057_v22 = vld [vmem:[%s4851_s2 + $0x2d4] ss:$8 sps:$4 sm:$0xff]  }
  0x18   :  { %443 = vmatprep.subr.bf16.mxu0 %v2978_v27  ;;  %v3055_v23 = vld [vmem:[%s4851_s2 + $0x2d0] ss:$8 sps:$4 sm:$0xff]   ;;  %v3060_v24 = vld [vmem:[%s4851_s2 + $0x2e4] ss:$8 sps:$4 sm:$0xff]   ;;  %v3058_v25 = vld [vmem:[%s4851_s2 + $0x2e0] ss:$8 sps:$4 sm:$0xff]  }
  0x19   :  { %v3063_v26 = vld [vmem:[%s4851_s2 + $0x2f4] ss:$8 sps:$4 sm:$0xff]   ;;  %v3061_v27 = vld [vmem:[%s4851_s2 + $0x2f0] ss:$8 sps:$4 sm:$0xff]   ;;  %v3085_v31 = vld [vmem:[%s4849_s1 + $0xc0] ss:$72 sps:$4 sm:$0xff]  }
  0x1a   :  { %2755 = vmatmul.mubr.msk.bf16.vlgmr.msra.gmra.mrb[4].mxu0 %vm298_vm1, %v3314_v10  ;;  %577 = vmatpush1.bf16.msra.mxu1 %v334_v40  ;;  %v3079_v29 = vld [vmem:[%s4849_s1 + $0x30] ss:$72 sps:$4 sm:$0xff]   ;;  %v3081_v30 = vld [vmem:[%s4849_s1 + $0x34] ss:$72 sps:$4 sm:$0xff]   ;;  %v3615_v49 = vld [vmem:[%s4852_s3 + $0xe8] sm:$0xff]  }
  0x1b   :  { %444 = vmatpush1.bf16.msra.mxu0 %v2976_v28  ;;  %475 = vmatprep.mubr.bf16.mxu0 %v4875_v1  ;;  %v3534_v28 = vld [vmem:[%s4851_s2 + $0x104] ss:$8 sps:$4 sm:$0xff]   ;;  %v65_v33 = vld [vmem:[%s4849_s1 + $0x150] sm:$0x33] }
  0x1c   :  { %445 = vmatprep.subr.bf16.mxu0 %v2981_v32  ;;  %658 = vmatprep.subr.bf16.mxu1 %v3010_v41  ;;  %v3087_v32 = vld [vmem:[%s4849_s1 + $0xc4] ss:$72 sps:$4 sm:$0xff]   ;;  %v2747_v34 = vcombine.high %v65_v33, %v65_v33  ;;  %v2746_v35 = vcombine.low %v65_v33, %v65_v33  ;;  %v3120_v39 = vld [vmem:[%s4849_s1 + $0xd0] ss:$72 sps:$4 sm:$0xff]   ;;  %v3122_v40 = vld [vmem:[%s4849_s1 + $0xd4] ss:$72 sps:$4 sm:$0xff]  }
  0x1d   :  { %2763 = vmatmul.mubr.msk.bf16.vlgmr.msra.gmra.mrb[4].mxu1 %vm298_vm1, %v3314_v10  ;;  %v67_v41 = vld [vmem:[%s4849_s1 + $0x160] sm:$0x33]  ;;  %v3593_v47 = vld [vmem:[%s4852_s3 + $0xd0] sm:$0xff]   ;;  %v3676_v33 = vld [vmem:[%s4852_s3 + $0x118] sm:$0xff]  }
  0x1e   :  { %659 = vmatpush1.bf16.msra.mxu1 %v3008_v44  ;;  %690 = vmatprep.mubr.bf16.mxu1 %v4875_v1  ;;  %v340_v36 = vsel %vm302_vm0, %v2746_v35, 0  ;;  %4907 = vst [vmem:[#allocation9_spill] sm:$0xff] %v3676_v33 }
  0x1f   :  { %446 = vmatpush1.bf16.msra.mxu0 %v2979_v37  ;;  %660 = vmatprep.subr.bf16.mxu1 %v3013_v45  ;;  %v3114_v37 = vld [vmem:[%s4849_s1 + $0x40] ss:$72 sps:$4 sm:$0xff]  }
  0x20   :  { %2756 = vmatprep.subr.msk.bf16.mxu0 %vm302_vm0, %v2739_v38  ;;  %v3116_v38 = vld [vmem:[%s4849_s1 + $0x44] ss:$72 sps:$4 sm:$0xff]  }
  0x21   :  { %v3578_v45 = vld [vmem:[%s4852_s3 + $0xc0] sm:$0xff]  }
  0x22   :  { %661 = vmatpush1.bf16.msra.mxu1 %v3011_v50  ;;  %v3620_v50 = vld [vmem:[%s4852_s3 + $0xf0] sm:$0xff]  }
  0x23   :  { %448 = vmatpush1.bf16.msra.mxu0 %v316_v43  ;;  %2766 = vmatprep.subr.msk.bf16.mxu1 %vm302_vm0, %v2749_v52  ;;  %v2750_v43 = vcombine.low %v67_v41, %v67_v41 }
  0x24   :  { %529 = vmatprep.subr.bf16.mxu0 %v2989_v42  ;;  %v2751_v42 = vcombine.high %v67_v41, %v67_v41 }
  0x25   :  { %v352_v44 = vsel %vm302_vm0, %v2750_v43, 0 }
  0x26   :  { %2757 = vmatmul.mubr.msk.bf16.vlgmr.msra.gmra.mrb[8].mxu0 %vm298_vm1, %v3314_v10  ;;  %663 = vmatpush1.bf16.msra.mxu1 %v346_v57 }
  0x27   :  { %530 = vmatpush1.bf16.msra.mxu0 %v2987_v46  ;;  %561 = vmatprep.mubr.bf16.mxu0 %v4875_v1  ;;  %v3586_v46 = vld [vmem:[%s4852_s3 + $0xc8] sm:$0xff]  }
  0x28   :  { %531 = vmatprep.subr.bf16.mxu0 %v2995_v48  ;;  %1141 = vmatprep.subr.bf16.mxu1 %v3018_v56  ;;  %v3606_v48 = vld [vmem:[%s4852_s3 + $0xe0] sm:$0xff]  }
  0x29   :  { %2767 = vmatmul.mubr.msk.bf16.vlgmr.msra.gmra.mrb[8].mxu1 %vm298_vm1, %v3314_v10 }
  0x2a   :  { %1142 = vmatpush1.bf16.msra.mxu1 %v3016_v58 }
  0x2b   :  { %532 = vmatpush1.bf16.msra.mxu0 %v2993_v51  ;;  %1143 = vmatprep.subr.bf16.mxu1 %v3021_v60 }
  0x2c   :  { %2760 = vmatprep.subr.msk.bf16.mxu0 %vm302_vm0, %v2743_v54  ;;  %v3628_v54 = vld [vmem:[%s4852_s3 + $0xf8] sm:$0xff]  }
  0x2d   :  { %4901 = vst [vmem:[#allocation3_spill] sm:$0xff] %v3628_v54 }
  0x2e   :  { %1144 = vmatpush1.bf16.msra.mxu1 %v3019_v61 }
  0x2f   :  { %534 = vmatpush1.bf16.msra.mxu0 %v328_v59  ;;  %1145 = vmatprep.subr.bf16.mxu1 %v3024_v62 }
  0x30   :  { %615 = vmatprep.subr.bf16.mxu0 %v3081_v30 }
  0x32   :  { %2761 = vmatmul.mubr.msk.bf16.vlgmr.msra.gmra.mrb[12].mxu0 %vm298_vm1, %v3314_v10  ;;  %1146 = vmatpush1.bf16.msra.mxu1 %v3022_v63 }
  0x33   :  { %647 = vmatprep.mubr.bf16.mxu0 %v4875_v1  ;;  %1147 = vmatprep.subr.bf16.mxu1 %v3027_v0 }
  0x34   :  { %616 = vmatpush1.bf16.msra.mxu0 %v3079_v29 }
  0x35   :  { %617 = vmatprep.subr.bf16.mxu0 %v3087_v32 }
  0x36   :  { %1148 = vmatpush1.bf16.msra.mxu1 %v3025_v2 }
  0x37   :  { %1149 = vmatprep.subr.bf16.mxu1 %v3030_v3  ;;  %v3644_v3 = vld [vmem:[%s4852_s3 + $0x100] sm:$0xff]  }
  0x38   :  { %618 = vmatpush1.bf16.msra.mxu0 %v3085_v31  ;;  %4902 = vst [vmem:[#allocation4_spill] sm:$0xff] %v3644_v3 }
  0x39   :  { %2764 = vmatprep.subr.msk.bf16.mxu0 %vm302_vm0, %v2747_v34 }
  0x3a   :  { %1150 = vmatpush1.bf16.msra.mxu1 %v3028_v4  ;;  %v3652_v4 = vld [vmem:[%s4852_s3 + $0x108] sm:$0xff]  }
  0x3b   :  { %1151 = vmatprep.subr.bf16.mxu1 %v3033_v5  ;;  %4903 = vst [vmem:[#allocation5_spill] sm:$0xff] %v3652_v4 }
  0x3c   :  { %620 = vmatpush1.bf16.msra.mxu0 %v340_v36 }
  0x3d   :  { %701 = vmatprep.subr.bf16.mxu0 %v3116_v38 }
  0x3e   :  { %1152 = vmatpush1.bf16.msra.mxu1 %v3031_v6 }
  0x3f   :  { %1153 = vmatprep.subr.bf16.mxu1 %v3036_v7  ;;  %2765 = vmatmul.mubr.msk.bf16.vlgmr.msra.gmra.mrb[16].mxu0 %vm298_vm1, %v3314_v10 }
  0x40   :  { %733 = vmatprep.mubr.bf16.mxu0 %v4875_v1  ;;  %702 = vmatpush1.bf16.msra.mxu0 %v3114_v37 }
  0x41   :  { %703 = vmatprep.subr.bf16.mxu0 %v3122_v40 }
  0x42   :  { %1154 = vmatpush1.bf16.msra.mxu1 %v3034_v8 }
  0x43   :  { %1155 = vmatprep.subr.bf16.mxu1 %v3039_v9 }
  0x44   :  { %704 = vmatpush1.bf16.msra.mxu0 %v3120_v39 }
  0x45   :  { %2768 = vmatprep.subr.msk.bf16.mxu0 %vm302_vm0, %v2751_v42 }
  0x46   :  { %1156 = vmatpush1.bf16.msra.mxu1 %v3037_v11 }
  0x47   :  { %1157 = vmatprep.subr.bf16.mxu1 %v3042_v12 }
  0x48   :  { %706 = vmatpush1.bf16.msra.mxu0 %v352_v44 }
  0x49   :  { %1498 = vmatprep.subr.bf16.mxu0 %v4875_v1 }
  0x4a   :  { %1158 = vmatpush1.bf16.msra.mxu1 %v3040_v13 }
  0x4b   :  { %1159 = vmatprep.subr.bf16.mxu1 %v3045_v14  ;;  %2769 = vmatmul.mubr.msk.bf16.vlgmr.msra.gmra.mrb[20].mxu0 %vm298_vm1, %v3314_v10  ;;  %v3599_v10 = vld [vmem:[%s4852_s3 + $0xd8] sm:$0xff]  }
  0x4c   :  { %1499 = vmatpush1.bf16.msra.mxu0 %v3578_v45 }
  0x4d   :  { %1500 = vmatprep.subr.bf16.mxu0 %v4875_v1 }
  0x4e   :  { %1160 = vmatpush1.bf16.msra.mxu1 %v3043_v15  ;;  %v3659_v15 = vld [vmem:[%s4852_s3 + $0x110] sm:$0xff]  }
  0x4f   :  { %1161 = vmatprep.subr.bf16.mxu1 %v3048_v17  ;;  %4904 = vst [vmem:[#allocation6_spill] sm:$0xff] %v3659_v15 }
  0x50   :  { %1501 = vmatpush1.bf16.msra.mxu0 %v3586_v46 }
  0x51   :  { %1502 = vmatprep.subr.bf16.mxu0 %v4875_v1 }
  0x52   :  { %1162 = vmatpush1.bf16.msra.mxu1 %v3046_v16 }
  0x53   :  { %1163 = vmatprep.subr.bf16.mxu1 %v3051_v18 }
  0x54   :  { %1503 = vmatpush1.bf16.msra.mxu0 %v3593_v47 }
  0x55   :  { %1504 = vmatprep.subr.bf16.mxu0 %v4875_v1 }
  0x56   :  { %1164 = vmatpush1.bf16.msra.mxu1 %v3049_v19 }
  0x57   :  { %1165 = vmatprep.subr.bf16.mxu1 %v3054_v20 }
  0x58   :  { %1505 = vmatpush1.bf16.msra.mxu0 %v3599_v10 }
  0x59   :  { %1506 = vmatprep.subr.bf16.mxu0 %v4875_v1 }
  0x5a   :  { %1166 = vmatpush1.bf16.msra.mxu1 %v3052_v21 }
  0x5b   :  { %1167 = vmatprep.subr.bf16.mxu1 %v3057_v22 }
  0x5c   :  { %1507 = vmatpush1.bf16.msra.mxu0 %v3606_v48 }
  0x5d   :  { %1508 = vmatprep.subr.bf16.mxu0 %v4875_v1 }
  0x5e   :  { %1168 = vmatpush1.bf16.msra.mxu1 %v3055_v23 }
  0x5f   :  { %1169 = vmatprep.subr.bf16.mxu1 %v3060_v24 }
  0x60   :  { %1509 = vmatpush1.bf16.msra.mxu0 %v3615_v49 }
  0x61   :  { %1510 = vmatprep.subr.bf16.mxu0 %v4875_v1 }
  0x62   :  { %1170 = vmatpush1.bf16.msra.mxu1 %v3058_v25 }
  0x63   :  { %1171 = vmatprep.subr.bf16.mxu1 %v3063_v26 }
  0x64   :  { %1511 = vmatpush1.bf16.msra.mxu0 %v3620_v50 }
  0x65   :  { %1512 = vmatprep.subr.bf16.mxu0 %v4875_v1 }
  0x66   :  { %1172 = vmatpush1.bf16.msra.mxu1 %v3061_v27  ;;  %v3973_v27 = vld [vmem:[%s4852_s3 + $0xb8] sm:$0xff]  }
  0x67   :  { %1344 = vmatprep.subr.bf16.mxu1 %v3534_v28 }
  0x68   :  { %1513 = vmatpush1.bf16.msra.mxu0 %v3628_v54 }
  0x69   :  { %1514 = vmatprep.subr.bf16.mxu0 %v4875_v1 }
  0x6c   :  { %1515 = vmatpush1.bf16.msra.mxu0 %v3644_v3  ;;  %v4086_v3 = vld [vmem:[%s4852_s3 + $0x40] sm:$0xff]  }
  0x6d   :  { %1516 = vmatprep.subr.bf16.mxu0 %v4875_v1 }
  0x70   :  { %1517 = vmatpush1.bf16.msra.mxu0 %v3652_v4 }
  0x71   :  { %1518 = vmatprep.subr.bf16.mxu0 %v4875_v1 }
  0x74   :  { %1519 = vmatpush1.bf16.msra.mxu0 %v3659_v15 }
  0x75   :  { %1520 = vmatprep.subr.bf16.mxu0 %v4875_v1 }
  0x78   :  { %1521 = vmatpush1.bf16.msra.mxu0 %v3676_v33 }
  0x79   :  { %1622 = vmatprep.subr.bf16.mxu0 %v4875_v1 }
  0xe1   :  { %v391_v51 = vpop.f32.mrb[0].mxu0 }
  0xe2   :  { %v780_v52 = vmul.f32 0.2, %v391_v51  ;;  %v393_v53 = vpop.f32.mrb[1].mxu0  ;;  %vm744_vm2 = vcmp.ge.f32.partialorder %v391_v51, 0.0 }
  0xe3   :  { %v781_v55 = vmul.f32 0.2, %v393_v53  ;;  %v395_v56 = vpop.f32.mrb[2].mxu0  ;;  %vm745_vm3 = vcmp.ge.f32.partialorder %v393_v53, 0.0 }
  0xe4   :  { %vm762_vm4 = vcmp.ge.f32.partialorder %v395_v56, 0.0  ;;  %v798_v57 = vmul.f32 0.2, %v395_v56  ;;  %v397_v58 = vpop.f32.mrb[3].mxu0  ;;  %v3631_v60 = vsel %vm744_vm2, %v391_v51, %v780_v52  ;;  %v520_v5 = vpop.f32.mrb[0].mxu1 }
  0xe5   :  { %vm763_vm5 = vcmp.ge.f32.partialorder %v397_v58, 0.0  ;;  %v799_v59 = vmul.f32 0.2, %v397_v58  ;;  %v817_v63 = vsel %vm745_vm3, %v393_v53, %v781_v55  ;;  %vm750_vm6 = vcmp.ge.f32.partialorder %v520_v5, 0.0  ;;  %v522_v7 = vpop.f32.mrb[1].mxu1 }
  0xe6   :  { %v3633_v61 = vsel %vm762_vm4, %v395_v56, %v798_v57  ;;  %v786_v6 = vmul.f32 0.2, %v520_v5  ;;  %vm751_vm7 = vcmp.ge.f32.partialorder %v522_v7, 0.0  ;;  %v787_v9 = vmul.f32 0.2, %v522_v7  ;;  %v524_v11 = vpop.f32.mrb[2].mxu1 }
  0xe7   :  { %v852_v62 = vpack.c.bf16 %v3633_v61, %v3631_v60  ;;  %v835_v0 = vsel %vm763_vm5, %v397_v58, %v799_v59  ;;  %vm768_vm8 = vcmp.ge.f32.partialorder %v524_v11, 0.0  ;;  %v526_v14 = vpop.f32.mrb[3].mxu1  ;;  %v804_v19 = vmul.f32 0.2, %v524_v11  ;;  %v3917_v60 = vld [vmem:[%s4852_s3 + $0x78] sm:$0xff]   ;;  %v3924_v61 = vld [vmem:[%s4852_s3 + $0x80] sm:$0xff]  }
  0xe8   :  { %v3639_v2 = vpack.c.bf16 %v835_v0, %v817_v63  ;;  %v3662_v18 = vsel %vm750_vm6, %v520_v5, %v786_v6  ;;  %v823_v22 = vsel %vm751_vm7, %v522_v7, %v787_v9  ;;  %vm769_vm13 = vcmp.ge.f32.partialorder %v526_v14, 0.0 }
  0xe9   :  { %4905 = vst [vmem:[#allocation7_spill] sm:$0xff] %v3662_v18  ;;  %v3667_v24 = vsel %vm768_vm8, %v524_v11, %v804_v19  ;;  %v805_v29 = vmul.f32 0.2, %v526_v14 }
  0xea   :  { %1541 = vrot.lane.b32.xlu1 %v3639_v2, %s3258_s12  ;;  %4906 = vst [vmem:[#allocation8_spill] sm:$0xff] %v3667_v24 }
  0xeb   :  { %v841_v35 = vsel %vm769_vm13, %v526_v14, %v805_v29  ;;  %v3698_v14 = vld [vmem:[%s4851_s2 + $0x114] ss:$8 sps:$4 sm:$0xff]   ;;  %v3722_v29 = vld [vmem:[%s4851_s2 + $0x120] ss:$8 sps:$4 sm:$0xff]  }
  0xec   :  { %v3681_v36 = vpack.c.bf16 %v841_v35, %v823_v22 }
  0xed   :  { %v434_v8 = vpop.f32.mrb[4].mxu0 }
  0xee   :  { %v782_v12 = vmul.f32 0.2, %v434_v8  ;;  %v436_v13 = vpop.f32.mrb[5].mxu0  ;;  %vm746_vm9 = vcmp.ge.f32.partialorder %v434_v8, 0.0 }
  0xef   :  { %v783_v16 = vmul.f32 0.2, %v436_v13  ;;  %v438_v17 = vpop.f32.mrb[6].mxu0  ;;  %vm747_vm10 = vcmp.ge.f32.partialorder %v436_v13, 0.0 }
  0xf0   :  { %vm764_vm11 = vcmp.ge.f32.partialorder %v438_v17, 0.0  ;;  %v800_v20 = vmul.f32 0.2, %v438_v17  ;;  %v440_v21 = vpop.f32.mrb[7].mxu0  ;;  %v818_v25 = vsel %vm746_vm9, %v434_v8, %v782_v12  ;;  %v606_v37 = vpop.f32.mrb[4].mxu1 }
  0xf1   :  { %vm765_vm12 = vcmp.ge.f32.partialorder %v440_v21, 0.0  ;;  %v801_v23 = vmul.f32 0.2, %v440_v21  ;;  %v819_v30 = vsel %vm747_vm10, %v436_v13, %v783_v16  ;;  %vm754_vm14 = vcmp.ge.f32.partialorder %v606_v37, 0.0  ;;  %v608_v39 = vpop.f32.mrb[5].mxu1 }
  0xf2   :  { %v836_v26 = vsel %vm764_vm11, %v438_v17, %v800_v20  ;;  %v790_v38 = vmul.f32 0.2, %v606_v37  ;;  %vm755_vm15 = vcmp.ge.f32.partialorder %v608_v39, 0.0  ;;  %v791_v41 = vmul.f32 0.2, %v608_v39  ;;  %v610_v42 = vpop.f32.mrb[6].mxu1 }
  0xf3   :  { %v837_v31 = vsel %vm765_vm12, %v440_v21, %v801_v23  ;;  %v854_v32 = vpack.c.bf16 %v836_v26, %v818_v25  ;;  %vm772_vm0 = vcmp.ge.f32.partialorder %v610_v42, 0.0  ;;  %v612_v51 = vpop.f32.mrb[7].mxu1  ;;  %v808_v56 = vmul.f32 0.2, %v610_v42  ;;  %v3691_v12 = vld [vmem:[%s4851_s2 + $0x100] ss:$8 sps:$4 sm:$0xff]  }
  0xf4   :  { %v3678_v34 = vpack.c.bf16 %v837_v31, %v819_v30  ;;  %v826_v55 = vsel %vm754_vm14, %v606_v37, %v790_v38  ;;  %v827_v59 = vsel %vm755_vm15, %v608_v39, %v791_v41  ;;  %vm773_vm5 = vcmp.ge.f32.partialorder %v612_v51, 0.0  ;;  %v3709_v20 = vld [vmem:[%s4851_s2 + $0x110] ss:$8 sps:$4 sm:$0xff]   ;;  %v3715_v21 = vld [vmem:[%s4851_s2 + $0x124] ss:$8 sps:$4 sm:$0xff]  }
  0xf5   :  { %1543 = vrot.lane.b32.xlu1 %v854_v32, %s3258_s12  ;;  %v844_v0 = vsel %vm772_vm0, %v610_v42, %v808_v56  ;;  %v809_v7 = vmul.f32 0.2, %v612_v51  ;;  %v3728_v32 = vld [vmem:[%s4851_s2 + $0x134] ss:$8 sps:$4 sm:$0xff]   ;;  %v3778_v56 = vld [vmem:[%s4851_s2 + $0x160] ss:$8 sps:$4 sm:$0xff]  }
  0xf6   :  { %4908 = vst [vmem:[#allocation10_spill] sm:$0xff] %v3678_v34  ;;  %v3686_v8 = vpack.c.bf16 %v844_v0, %v826_v55  ;;  %v3772_v55 = vld [vmem:[%s4851_s2 + $0x164] ss:$8 sps:$4 sm:$0xff]   ;;  %v3808_v0 = vld [vmem:[%s4851_s2 + $0x194] ss:$8 sps:$4 sm:$0xff]   ;;  %vm1419_vm12 = vcmask 523264  }
  0xf7   :  { %v845_v17 = vsel %vm773_vm5, %v612_v51, %v809_v7  ;;  %v3753_v51 = vld [vmem:[%s4851_s2 + $0x140] ss:$8 sps:$4 sm:$0xff]  }
  0xf8   :  { %4909 = vst [vmem:[#allocation11_spill] sm:$0xff] %v3686_v8  ;;  %v863_v19 = vpack.c.bf16 %v845_v17, %v827_v59  ;;  %v3796_v59 = vld [vmem:[%s4851_s2 + $0x184] ss:$8 sps:$4 sm:$0xff]   ;;  %v3826_v7 = vld [vmem:[%s4851_s2 + $0x1a0] ss:$8 sps:$4 sm:$0xff]  }
  0xf9   :  { %v477_v40 = vpop.f32.mrb[8].mxu0  ;;  %4914 = vst [vmem:[#allocation16_spill] sm:$0xff] %v3826_v7  ;;  %v3850_v17 = vld [vmem:[%s4851_s2 + $0x1c0] ss:$8 sps:$4 sm:$0xff]  }
  0xfa   :  { %v784_v43 = vmul.f32 0.2, %v477_v40  ;;  %v479_v44 = vpop.f32.mrb[9].mxu0  ;;  %vm748_vm1 = vcmp.ge.f32.partialorder %v477_v40, 0.0  ;;  %4918 = vst [vmem:[#allocation20_spill] sm:$0xff] %v3850_v17 }
  0xfb   :  { %v785_v52 = vmul.f32 0.2, %v479_v44  ;;  %v481_v53 = vpop.f32.mrb[10].mxu0  ;;  %vm749_vm2 = vcmp.ge.f32.partialorder %v479_v44, 0.0 }
  0xfc   :  { %vm766_vm3 = vcmp.ge.f32.partialorder %v481_v53, 0.0  ;;  %v802_v57 = vmul.f32 0.2, %v481_v53  ;;  %v483_v58 = vpop.f32.mrb[11].mxu0  ;;  %v820_v5 = vsel %vm748_vm1, %v477_v40, %v784_v43  ;;  %v3736_v40 = vld [vmem:[%s4851_s2 + $0x130] ss:$8 sps:$4 sm:$0xff]  }
  0xfd   :  { %vm767_vm4 = vcmp.ge.f32.partialorder %v483_v58, 0.0  ;;  %v803_v63 = vmul.f32 0.2, %v483_v58  ;;  %v821_v9 = vsel %vm749_vm2, %v479_v44, %v785_v52  ;;  %v3742_v43 = vld [vmem:[%s4851_s2 + $0x144] ss:$8 sps:$4 sm:$0xff]  }
  0xfe   :  { %v838_v6 = vsel %vm766_vm3, %v481_v53, %v802_v57  ;;  %v3759_v52 = vld [vmem:[%s4851_s2 + $0x154] ss:$8 sps:$4 sm:$0xff]   ;;  %v3766_v53 = vld [vmem:[%s4851_s2 + $0x150] ss:$8 sps:$4 sm:$0xff]  }
  0xff   :  { %v839_v11 = vsel %vm767_vm4, %v483_v58, %v803_v63  ;;  %v3693_v13 = vpack.c.bf16 %v838_v6, %v820_v5  ;;  %v3784_v57 = vld [vmem:[%s4851_s2 + $0x174] ss:$8 sps:$4 sm:$0xff]   ;;  %v3790_v58 = vld [vmem:[%s4851_s2 + $0x170] ss:$8 sps:$4 sm:$0xff]   ;;  %v3802_v63 = vld [vmem:[%s4851_s2 + $0x180] ss:$8 sps:$4 sm:$0xff]  }
 0x100   :  { %v857_v16 = vpack.c.bf16 %v839_v11, %v821_v9  ;;  %v3814_v5 = vld [vmem:[%s4851_s2 + $0x190] ss:$8 sps:$4 sm:$0xff]   ;;  %v3820_v6 = vld [vmem:[%s4851_s2 + $0x1a4] ss:$8 sps:$4 sm:$0xff]   ;;  %v3832_v9 = vld [vmem:[%s4851_s2 + $0x1b4] ss:$8 sps:$4 sm:$0xff]  }
 0x101   :  { %4910 = vst [vmem:[#allocation12_spill] sm:$0xff] %v3693_v13  ;;  %1415 = vrot.lane.b32.xlu0 %v3693_v13, %s3258_s12  ;;  %1173 = vmatprep.mubr.bf16.mxu1 %v3693_v13  ;;  %4912 = vst [vmem:[#allocation14_spill] sm:$0xff] %v3814_v5  ;;  %v3838_v11 = vld [vmem:[%s4851_s2 + $0x1b0] ss:$8 sps:$4 sm:$0xff]  }
 0x102   :  { %1174 = vmatmul.mubr.bf16.vlgmr.msra.gmra.mrb[12].mxu1 %v3678_v34  ;;  %4913 = vst [vmem:[#allocation15_spill] sm:$0xff] %v3820_v6  ;;  %4915 = vst [vmem:[#allocation17_spill] sm:$0xff] %v3832_v9  ;;  %v692_v34 = vpop.f32.mrb[8].mxu1 }
 0x103   :  { %1345 = vmatpush1.bf16.msra.mxu1 %v3691_v12  ;;  %1376 = vmatprep.mubr.bf16.mxu1 %v3639_v2  ;;  %4916 = vst [vmem:[#allocation18_spill] sm:$0xff] %v3838_v11  ;;  %vm758_vm10 = vcmp.ge.f32.partialorder %v692_v34, 0.0  ;;  %v694_v13 = vpop.f32.mrb[9].mxu1 }
 0x104   :  { %1346 = vmatprep.subr.bf16.mxu1 %v3698_v14  ;;  %vm759_vm11 = vcmp.ge.f32.partialorder %v694_v13, 0.0  ;;  %v696_v4 = vpop.f32.mrb[10].mxu1 }
 0x105   :  { %1417 = vrot.lane.b32.xlu0 %v857_v16, %s3258_s12  ;;  %v563_v22 = vpop.f32.mrb[12].mxu0  ;;  %v3844_v16 = vld [vmem:[%s4851_s2 + $0x1c4] ss:$8 sps:$4 sm:$0xff]   ;;  %vm776_vm0 = vcmp.ge.f32.partialorder %v696_v4, 0.0 }
 0x106   :  { %vm752_vm6 = vcmp.ge.f32.partialorder %v563_v22, 0.0  ;;  %v788_v23 = vmul.f32 0.2, %v563_v22  ;;  %v565_v25 = vpop.f32.mrb[13].mxu0  ;;  %4917 = vst [vmem:[#allocation19_spill] sm:$0xff] %v3844_v16 }
 0x107   :  { %vm753_vm7 = vcmp.ge.f32.partialorder %v565_v25, 0.0  ;;  %v789_v2 = vmul.f32 0.2, %v565_v25  ;;  %1347 = vmatpush1.bf16.msra.mxu1 %v3709_v20  ;;  %v567_v26 = vpop.f32.mrb[14].mxu0 }
 0x108   :  { %v824_v30 = vsel %vm752_vm6, %v563_v22, %v788_v23  ;;  %vm770_vm8 = vcmp.ge.f32.partialorder %v567_v26, 0.0  ;;  %v806_v31 = vmul.f32 0.2, %v567_v26  ;;  %1348 = vmatprep.subr.bf16.mxu1 %v3715_v21  ;;  %v569_v35 = vpop.f32.mrb[15].mxu0  ;;  %v3862_v22 = vld [vmem:[%s4851_s2 + $0x1d0] ss:$8 sps:$4 sm:$0xff]  }
 0x109   :  { %v825_v37 = vsel %vm753_vm7, %v565_v25, %v789_v2  ;;  %2014 = vrot.lane.b32.xlu0 %v3681_v36, %s3258_s12  ;;  %vm771_vm9 = vcmp.ge.f32.partialorder %v569_v35, 0.0  ;;  %v807_v38 = vmul.f32 0.2, %v569_v35  ;;  %4920 = vst [vmem:[#allocation22_spill] sm:$0xff] %v3862_v22  ;;  %v3868_v23 = vld [vmem:[%s4851_s2 + $0x1e4] ss:$8 sps:$4 sm:$0xff]  }
 0x10a   :  { %v842_v39 = vsel %vm770_vm8, %v567_v26, %v806_v31  ;;  %4921 = vst [vmem:[#allocation23_spill] sm:$0xff] %v3868_v23  ;;  %v3874_v25 = vld [vmem:[%s4851_s2 + $0x1e0] ss:$8 sps:$4 sm:$0xff]   ;;  %v3880_v2 = vld [vmem:[%s4851_s2 + $0x1f4] ss:$8 sps:$4 sm:$0xff]  }
 0x10b   :  { %1349 = vmatpush1.bf16.msra.mxu1 %v3722_v29  ;;  %v860_v41 = vpack.c.bf16 %v842_v39, %v824_v30  ;;  %v843_v42 = vsel %vm771_vm9, %v569_v35, %v807_v38  ;;  %4922 = vst [vmem:[#allocation24_spill] sm:$0xff] %v3874_v25  ;;  %4923 = vst [vmem:[#allocation25_spill] sm:$0xff] %v3880_v2  ;;  %v3886_v26 = vld [vmem:[%s4851_s2 + $0x1f0] ss:$8 sps:$4 sm:$0xff]   ;;  %v3893_v30 = vld [vmem:[%s4852_s3 + $0x60] sm:$0xff]  }
 0x10c   :  { %1350 = vmatprep.subr.bf16.mxu1 %v3728_v32  ;;  %v3744_v44 = vpack.c.bf16 %v843_v42, %v825_v37  ;;  %4924 = vst [vmem:[#allocation26_spill] sm:$0xff] %v3886_v26  ;;  %4925 = vst [vmem:[#allocation27_spill] sm:$0xff] %v3893_v30  ;;  %v3903_v31 = vld [vmem:[%s4852_s3 + $0x68] sm:$0xff]   ;;  %v3910_v35 = vld [vmem:[%s4852_s3 + $0x70] sm:$0xff]  }
 0x10d   :  { %2016 = vrot.lane.b32.xlu1 %v860_v41, %s3258_s12  ;;  %2230 = vrot.lane.b32.xlu0 %v3686_v8, %s3258_s12  ;;  %v3938_v37 = vld [vmem:[%s4852_s3 + $0x90] sm:$0xff]   ;;  %v3945_v38 = vld [vmem:[%s4852_s3 + $0x98] sm:$0xff]   ;;  %v794_v8 = vmul.f32 0.2, %v692_v34 }
 0x10e   :  { %4911 = vst [vmem:[#allocation13_spill] sm:$0xff] %v3744_v44  ;;  %v3952_v39 = vld [vmem:[%s4852_s3 + $0xa0] sm:$0xff]   ;;  %v3959_v41 = vld [vmem:[%s4852_s3 + $0xa8] sm:$0xff]   ;;  %v3966_v42 = vld [vmem:[%s4852_s3 + $0xb0] sm:$0xff]  }
 0x10f   :  { %1351 = vmatpush1.bf16.msra.mxu1 %v3736_v40  ;;  %v830_v33 = vsel %vm758_vm10, %v692_v34, %v794_v8  ;;  %v812_v8 = vmul.f32 0.2, %v696_v4 }
 0x110   :  { %1352 = vmatprep.subr.bf16.mxu1 %v3742_v43 }
 0x111   :  { %2232 = vrot.lane.b32.xlu1 %v863_v19, %s3258_s12  ;;  %v3856_v19 = vld [vmem:[%s4851_s2 + $0x1d4] ss:$8 sps:$4 sm:$0xff]  }
 0x112   :  { %4919 = vst [vmem:[#allocation21_spill] sm:$0xff] %v3856_v19  ;;  %v649_v24 = vpop.f32.mrb[16].mxu0 }
 0x113   :  { %1353 = vmatpush1.bf16.msra.mxu1 %v3753_v51  ;;  %vm756_vm13 = vcmp.ge.f32.partialorder %v649_v24, 0.0 }
 0x114   :  { %1354 = vmatprep.subr.bf16.mxu1 %v3759_v52 }
 0x117   :  { %1355 = vmatpush1.bf16.msra.mxu1 %v3766_v53 }
 0x118   :  { %1356 = vmatprep.subr.bf16.mxu1 %v3772_v55 }
 0x11b   :  { %1357 = vmatpush1.bf16.msra.mxu1 %v3778_v56 }
 0x11c   :  { %1358 = vmatprep.subr.bf16.mxu1 %v3784_v57 }
 0x11f   :  { %1359 = vmatpush1.bf16.msra.mxu1 %v3790_v58 }
 0x120   :  { %1360 = vmatprep.subr.bf16.mxu1 %v3796_v59 }
 0x123   :  { %1361 = vmatpush1.bf16.msra.mxu1 %v3802_v63 }
 0x124   :  { %1362 = vmatprep.subr.bf16.mxu1 %v3808_v0 }
 0x127   :  { %1363 = vmatpush1.bf16.msra.mxu1 %v3814_v5 }
 0x128   :  { %1364 = vmatprep.subr.bf16.mxu1 %v3820_v6 }
 0x12b   :  { %1365 = vmatpush1.bf16.msra.mxu1 %v3826_v7 }
 0x12c   :  { %1366 = vmatprep.subr.bf16.mxu1 %v3832_v9 }
 0x12f   :  { %1367 = vmatpush1.bf16.msra.mxu1 %v3838_v11 }
 0x130   :  { %1368 = vmatprep.subr.bf16.mxu1 %v3844_v16 }
 0x133   :  { %1369 = vmatpush1.bf16.msra.mxu1 %v3850_v17 }
 0x134   :  { %1370 = vmatprep.subr.bf16.mxu1 %v3856_v19 }
 0x137   :  { %1371 = vmatpush1.bf16.msra.mxu1 %v3862_v22 }
 0x138   :  { %1372 = vmatprep.subr.bf16.mxu1 %v3868_v23 }
 0x13b   :  { %1373 = vmatpush1.bf16.msra.mxu1 %v3874_v25  ;;  %v651_v25 = vpop.f32.mrb[17].mxu0 }
 0x13c   :  { %1374 = vmatprep.subr.bf16.mxu1 %v3880_v2  ;;  %v792_v2 = vmul.f32 0.2, %v649_v24  ;;  %vm757_vm14 = vcmp.ge.f32.partialorder %v651_v25, 0.0  ;;  %v793_v22 = vmul.f32 0.2, %v651_v25 }
 0x13e   :  { %v3986_v17 = vsel %vm756_vm13, %v649_v24, %v792_v2  ;;  %v829_v34 = vsel %vm757_vm14, %v651_v25, %v793_v22  ;;  %v848_v22 = vsel %vm776_vm0, %v696_v4, %v812_v8 }
 0x13f   :  { %1375 = vmatpush1.bf16.msra.mxu1 %v3886_v26  ;;  %v795_v26 = vmul.f32 0.2, %v694_v13  ;;  %v866_v54 = vpack.c.bf16 %v848_v22, %v830_v33  ;;  %v4022_v33 = vld [vmem:[%s4852_s3 + $0x8] sm:$0xff]  }
 0x140   :  { %2023 = vmatprep.subr.bf16.mxu1 %v4875_v1 }
 0x141   :  { %v3980_v19 = vsel %vm759_vm11, %v694_v13, %v795_v26  ;;  %v698_v13 = vpop.f32.mrb[11].mxu1  ;;  %v4926_v26 = vmov 0   ;;  %2425 = vrot.lane.b32.xlu1 %v866_v54, %s3258_s12  ;;  %v4032_v54 = vld [vmem:[%s4852_s3 + $0x10] sm:$0xff]  }
 0x142   :  { %1377 = vmatmul.mubr.bf16.vlgmr.msra.gmra.mrb[12].mxu1 %v852_v62  ;;  %v3931_v62 = vld [vmem:[%s4852_s3 + $0x88] sm:$0xff]   ;;  %vm777_vm2 = vcmp.ge.f32.partialorder %v698_v13, 0.0  ;;  %v813_v2 = vmul.f32 0.2, %v698_v13 }
 0x143   :  { %2024 = vmatpush1.bf16.msra.mxu1 %v3893_v30 }
 0x144   :  { %2025 = vmatprep.subr.bf16.mxu1 %v4875_v1  ;;  %v3999_v7 = vsel %vm777_vm2, %v698_v13, %v813_v2  ;;  %v4077_v13 = vld [vmem:[%s4852_s3 + $0x38] sm:$0xff]  }
 0x145   :  { %4931 = vst [vmem:[#allocation32_spill] sm:$0xff] %v4077_v13 }
 0x147   :  { %2026 = vmatpush1.bf16.msra.mxu1 %v3903_v31 }
 0x148   :  { %2027 = vmatprep.subr.bf16.mxu1 %v4875_v1 }
 0x14b   :  { %2028 = vmatpush1.bf16.msra.mxu1 %v3910_v35 }
 0x14c   :  { %2029 = vmatprep.subr.bf16.mxu1 %v4875_v1 }
 0x14f   :  { %2030 = vmatpush1.bf16.msra.mxu1 %v3917_v60 }
 0x150   :  { %2031 = vmatprep.subr.bf16.mxu1 %v4875_v1 }
 0x153   :  { %2032 = vmatpush1.bf16.msra.mxu1 %v3924_v61 }
 0x154   :  { %2033 = vmatprep.subr.bf16.mxu1 %v4875_v1 }
 0x157   :  { %2034 = vmatpush1.bf16.msra.mxu1 %v3931_v62 }
 0x158   :  { %2035 = vmatprep.subr.bf16.mxu1 %v4875_v1 }
 0x15b   :  { %2036 = vmatpush1.bf16.msra.mxu1 %v3938_v37 }
 0x15c   :  { %2037 = vmatprep.subr.bf16.mxu1 %v4875_v1  ;;  %v3978_v18 = vpop.permute.xlu1 %1541 }
 0x15f   :  { %2038 = vmatpush1.bf16.msra.mxu1 %v3945_v38 }
 0x160   :  { %2039 = vmatprep.subr.bf16.mxu1 %v4875_v1 }
 0x163   :  { %2040 = vmatpush1.bf16.msra.mxu1 %v3952_v39 }
 0x164   :  { %2041 = vmatprep.subr.bf16.mxu1 %v4875_v1 }
 0x167   :  { %2042 = vmatpush1.bf16.msra.mxu1 %v3959_v41  ;;  %v3988_v9 = vpop.permute.xlu1 %1543 }
 0x168   :  { %2043 = vmatprep.subr.bf16.mxu1 %v4875_v1 }
 0x16b   :  { %2044 = vmatpush1.bf16.msra.mxu1 %v3966_v42 }
 0x16c   :  { %2045 = vmatprep.subr.bf16.mxu1 %v4875_v1 }
 0x16f   :  { %2046 = vmatpush1.bf16.msra.mxu1 %v3973_v27 }
 0x170   :  { %2136 = vmatprep.subr.bf16.mxu1 %v4875_v1  ;;  %v653_v1 = vpop.f32.mrb[18].mxu0 }
 0x171   :  { %vm774_vm15 = vcmp.ge.f32.partialorder %v653_v1, 0.0  ;;  %v810_v16 = vmul.f32 0.2, %v653_v1  ;;  %v655_v11 = vpop.f32.mrb[19].mxu0 }
 0x172   :  { %vm775_vm1 = vcmp.ge.f32.partialorder %v655_v11, 0.0  ;;  %v735_v8 = vpop.f32.mrb[20].mxu0 }
 0x173   :  { %v1416_v44 = vpop.permute.xlu0 %1415  ;;  %v3994_v24 = vsel %vm774_vm15, %v653_v1, %v810_v16  ;;  %v4009_v1 = vld [vmem:[%s4852_s3] sm:$0xff]   ;;  %vm760_vm3 = vcmp.ge.f32.partialorder %v735_v8, 0.0  ;;  %v796_v2 = vmul.f32 0.2, %v735_v8 }
 0x177   :  { %v1418_v23 = vpop.permute.xlu0 %1417 }
 0x178   :  { %2846 = vmatprep.mubr.msk.bf16.mxu0 %vm1419_vm12, %v1418_v23  ;;  %v3984_v15 = vsel %vm1419_vm12, %v1416_v44, %v1418_v23  ;;  %v811_v44 = vmul.f32 0.2, %v655_v11 }
 0x179   :  { %1531 = vmatmul.mubr.bf16.vlgmr.msra.gmra.mrb[24].mxu0 %v3984_v15 }
 0x17a   :  { %1623 = vmatpush1.bf16.msra.mxu0 %v3893_v30  ;;  %2859 = vmatprep.mubr.msk.bf16.mxu0 %vm1419_vm12, %v3988_v9  ;;  %v847_v25 = vsel %vm775_vm1, %v655_v11, %v811_v44  ;;  %v4050_v11 = vld [vmem:[%s4852_s3 + $0x20] sm:$0xff]   ;;  %v737_v44 = vpop.f32.mrb[21].mxu0 }
 0x17b   :  { %1624 = vmatprep.subr.bf16.mxu0 %v4926_v26  ;;  %v2015_v6 = vpop.permute.xlu0 %2014  ;;  %v4003_v5 = vpack.c.bf16 %v847_v25, %v829_v34  ;;  %4928 = vst [vmem:[#allocation29_spill] sm:$0xff] %v4050_v11  ;;  %v4068_v34 = vld [vmem:[%s4852_s3 + $0x30] sm:$0xff]   ;;  %v739_v22 = vpop.f32.mrb[22].mxu0  ;;  %vm761_vm4 = vcmp.ge.f32.partialorder %v737_v44, 0.0  ;;  %v797_v25 = vmul.f32 0.2, %v737_v44 }
 0x17c   :  { %4930 = vst [vmem:[#allocation31_spill] sm:$0xff] %v4068_v34  ;;  %vm778_vm5 = vcmp.ge.f32.partialorder %v739_v22, 0.0  ;;  %v741_v30 = vpop.f32.mrb[23].mxu0 }
 0x17d   :  { %2423 = vrot.lane.b32.xlu0 %v4003_v5, %s3258_s12  ;;  %vm779_vm6 = vcmp.ge.f32.partialorder %v741_v30, 0.0 }
 0x17e   :  { %1625 = vmatpush1.bf16.msra.mxu0 %v3903_v31 }
 0x17f   :  { %v2017_v16 = vpop.permute.xlu1 %2016  ;;  %1626 = vmatprep.subr.bf16.mxu0 %v4926_v26 }
 0x180   :  { %v2018_v4 = vsel %vm1419_vm12, %v2015_v6, %v2017_v16  ;;  %2893 = vmatprep.mubr.msk.bf16.mxu1 %vm1419_vm12, %v2017_v16  ;;  %v4041_v6 = vld [vmem:[%s4852_s3 + $0x18] sm:$0xff]   ;;  %v814_v16 = vmul.f32 0.2, %v739_v22 }
 0x181   :  { %2056 = vmatmul.mubr.bf16.vlgmr.msra.gmra.mrb[16].mxu1 %v2018_v4  ;;  %4927 = vst [vmem:[#allocation28_spill] sm:$0xff] %v4041_v6  ;;  %v832_v4 = vsel %vm760_vm3, %v735_v8, %v796_v2 }
 0x182   :  { %1627 = vmatpush1.bf16.msra.mxu0 %v3910_v35  ;;  %2137 = vmatpush1.bf16.msra.mxu1 %v4009_v1 }
 0x183   :  { %2906 = vmatprep.mubr.msk.bf16.mxu1 %vm1419_vm12, %v1418_v23  ;;  %1628 = vmatprep.subr.bf16.mxu0 %v4926_v26  ;;  %v4059_v23 = vld [vmem:[%s4852_s3 + $0x28] sm:$0xff]  }
 0x184   :  { %2138 = vmatprep.subr.bf16.mxu1 %v4926_v26  ;;  %4929 = vst [vmem:[#allocation30_spill] sm:$0xff] %v4059_v23 }
 0x186   :  { %1629 = vmatpush1.bf16.msra.mxu0 %v3917_v60  ;;  %2139 = vmatpush1.bf16.msra.mxu1 %v4022_v33 }
 0x187   :  { %1630 = vmatprep.subr.bf16.mxu0 %v4926_v26  ;;  %2140 = vmatprep.subr.bf16.mxu1 %v4926_v26 }
 0x18a   :  { %1631 = vmatpush1.bf16.msra.mxu0 %v3924_v61  ;;  %2141 = vmatpush1.bf16.msra.mxu1 %v4032_v54 }
 0x18b   :  { %1632 = vmatprep.subr.bf16.mxu0 %v4926_v26  ;;  %2142 = vmatprep.subr.bf16.mxu1 %v4926_v26 }
 0x18e   :  { %1633 = vmatpush1.bf16.msra.mxu0 %v3931_v62  ;;  %2143 = vmatpush1.bf16.msra.mxu1 %v4041_v6 }
 0x18f   :  { %1634 = vmatprep.subr.bf16.mxu0 %v4926_v26  ;;  %2144 = vmatprep.subr.bf16.mxu1 %v4926_v26 }
 0x192   :  { %1635 = vmatpush1.bf16.msra.mxu0 %v3938_v37  ;;  %2145 = vmatpush1.bf16.msra.mxu1 %v4050_v11  ;;  %v815_v11 = vmul.f32 0.2, %v741_v30 }
 0x193   :  { %1636 = vmatprep.subr.bf16.mxu0 %v4926_v26  ;;  %2146 = vmatprep.subr.bf16.mxu1 %v4926_v26 }
 0x194   :  { %v851_v6 = vsel %vm779_vm6, %v741_v30, %v815_v11  ;;  %v4111_v30 = vld [vmem:[%s4852_s3 + $0x50] sm:$0xff]   ;;  %v4942_v11 = vld [vmem:[#allocation6_spill] sm:$0xff] }
 0x196   :  { %1637 = vmatpush1.bf16.msra.mxu0 %v3945_v38  ;;  %2147 = vmatpush1.bf16.msra.mxu1 %v4059_v23  ;;  %v850_v23 = vsel %vm778_vm5, %v739_v22, %v814_v16  ;;  %v4945_v22 = vld [vmem:[#allocation9_spill] sm:$0xff] }
 0x197   :  { %1638 = vmatprep.subr.bf16.mxu0 %v4926_v26  ;;  %2148 = vmatprep.subr.bf16.mxu1 %v4926_v26  ;;  %v4090_v8 = vpack.c.bf16 %v850_v23, %v832_v4  ;;  %v4943_v23 = vld [vmem:[#allocation21_spill] sm:$0xff]  ;;  %v3212_v4 = vld [vmem:[%s4851_s2 + $0x104] ss:$8 sps:$4 sm:$0xff]  }
 0x199   :  { %2567 = vrot.lane.b32.xlu0 %v4090_v8, %s3258_s12 }
 0x19a   :  { %1639 = vmatpush1.bf16.msra.mxu0 %v3952_v39  ;;  %2149 = vmatpush1.bf16.msra.mxu1 %v4068_v34  ;;  %v833_v34 = vsel %vm761_vm4, %v737_v44, %v797_v25  ;;  %v4944_v44 = vld [vmem:[#allocation22_spill] sm:$0xff]  ;;  %v4946_v25 = vld [vmem:[#allocation23_spill] sm:$0xff] }
 0x19b   :  { %1640 = vmatprep.subr.bf16.mxu0 %v4926_v26  ;;  %2150 = vmatprep.subr.bf16.mxu1 %v4926_v26  ;;  %v869_v2 = vpack.c.bf16 %v851_v6, %v833_v34  ;;  %v1545_v6 = vsel %vm1419_vm12, %v3978_v18, %v3988_v9  ;;  %v4130_v18 = vpop.permute.xlu1 %2232  ;;  %v4941_v9 = vld [vmem:[#allocation20_spill] sm:$0xff]  ;;  %v2231_v34 = vpop.permute.xlu0 %2230 }
 0x19c   :  { %v4184_v16 = vsel %vm1419_vm12, %v2231_v34, %v4130_v18  ;;  %v4953_v34 = vld [vmem:[#allocation12_spill] sm:$0xff] }
 0x19d   :  { %2569 = vrot.lane.b32.xlu1 %v869_v2, %s3258_s12  ;;  %v4947_v2 = vld [vmem:[#allocation24_spill] sm:$0xff] }
 0x19e   :  { %1641 = vmatpush1.bf16.msra.mxu0 %v3959_v41  ;;  %2151 = vmatpush1.bf16.msra.mxu1 %v4077_v13  ;;  %v4097_v13 = vld [vmem:[%s4852_s3 + $0x48] sm:$0xff]  }
 0x19f   :  { %1642 = vmatprep.subr.bf16.mxu0 %v4926_v26  ;;  %2152 = vmatprep.subr.bf16.mxu1 %v4926_v26 }
 0x1a2   :  { %1643 = vmatpush1.bf16.msra.mxu0 %v3966_v42  ;;  %2153 = vmatpush1.bf16.msra.mxu1 %v4086_v3 }
 0x1a3   :  { %1644 = vmatprep.subr.bf16.mxu0 %v4926_v26  ;;  %2154 = vmatprep.subr.bf16.mxu1 %v4926_v26 }
 0x1a6   :  { %1645 = vmatpush1.bf16.msra.mxu0 %v3973_v27  ;;  %2155 = vmatpush1.bf16.msra.mxu1 %v4097_v13 }
 0x1a7   :  { %1764 = vmatprep.subr.bf16.mxu0 %v3534_v28  ;;  %2156 = vmatprep.subr.bf16.mxu1 %v4926_v26  ;;  %v4123_v28 = vld [vmem:[%s4852_s3 + $0x58] sm:$0xff]  }
 0x1a9   :  { %1655 = vmatmul.mubr.bf16.vlgmr.msra.gmra.mrb[24].mxu0 %v1545_v6  ;;  %v4948_v6 = vld [vmem:[#allocation25_spill] sm:$0xff] }
 0x1aa   :  { %1765 = vmatpush1.bf16.msra.mxu0 %v3691_v12  ;;  %1796 = vmatprep.mubr.bf16.mxu0 %v3681_v36  ;;  %v4940_v36 = vld [vmem:[#allocation19_spill] sm:$0xff] }
 0x1ab   :  { %2157 = vmatpush1.bf16.msra.mxu1 %v4111_v30  ;;  %1766 = vmatprep.subr.bf16.mxu0 %v3698_v14 }
 0x1ac   :  { %2158 = vmatprep.subr.bf16.mxu1 %v4926_v26 }
 0x1ae   :  { %1767 = vmatpush1.bf16.msra.mxu0 %v3709_v20 }
 0x1af   :  { %2159 = vmatpush1.bf16.msra.mxu1 %v4123_v28  ;;  %1768 = vmatprep.subr.bf16.mxu0 %v3715_v21 }
 0x1b0   :  { %2239 = vmatprep.subr.bf16.mxu1 %v4926_v26 }
 0x1b2   :  { %2169 = vmatmul.mubr.bf16.vlgmr.msra.gmra.mrb[16].mxu1 %v3984_v15  ;;  %1769 = vmatpush1.bf16.msra.mxu0 %v3722_v29  ;;  %v4939_v15 = vld [vmem:[#allocation5_spill] sm:$0xff] }
 0x1b3   :  { %2240 = vmatpush1.bf16.msra.mxu1 %v3578_v45  ;;  %1770 = vmatprep.subr.bf16.mxu0 %v3728_v32  ;;  %v4932_v45 = vld [vmem:[#allocation14_spill] sm:$0xff] }
 0x1b4   :  { %2241 = vmatprep.subr.bf16.mxu1 %v4926_v26  ;;  %2907 = vmatprep.mubr.msk.bf16.mxu1 %vm1419_vm12, %v4130_v18 }
 0x1b6   :  { %1771 = vmatpush1.bf16.msra.mxu0 %v3736_v40 }
 0x1b7   :  { %2242 = vmatpush1.bf16.msra.mxu1 %v3586_v46  ;;  %1772 = vmatprep.subr.bf16.mxu0 %v3742_v43  ;;  %v4933_v46 = vld [vmem:[#allocation3_spill] sm:$0xff] }
 0x1b8   :  { %2243 = vmatprep.subr.bf16.mxu1 %v4926_v26 }
 0x1ba   :  { %1773 = vmatpush1.bf16.msra.mxu0 %v3753_v51 }
 0x1bb   :  { %2244 = vmatpush1.bf16.msra.mxu1 %v3593_v47  ;;  %1774 = vmatprep.subr.bf16.mxu0 %v3759_v52  ;;  %v4934_v47 = vld [vmem:[#allocation15_spill] sm:$0xff] }
 0x1bc   :  { %2245 = vmatprep.subr.bf16.mxu1 %v4926_v26 }
 0x1be   :  { %1775 = vmatpush1.bf16.msra.mxu0 %v3766_v53 }
 0x1bf   :  { %2246 = vmatpush1.bf16.msra.mxu1 %v3599_v10  ;;  %1776 = vmatprep.subr.bf16.mxu0 %v3772_v55  ;;  %v4935_v10 = vld [vmem:[#allocation16_spill] sm:$0xff] }
 0x1c0   :  { %2247 = vmatprep.subr.bf16.mxu1 %v4926_v26 }
 0x1c2   :  { %1777 = vmatpush1.bf16.msra.mxu0 %v3778_v56 }
 0x1c3   :  { %2248 = vmatpush1.bf16.msra.mxu1 %v3606_v48  ;;  %1778 = vmatprep.subr.bf16.mxu0 %v3784_v57  ;;  %v4936_v48 = vld [vmem:[#allocation4_spill] sm:$0xff] }
 0x1c4   :  { %2249 = vmatprep.subr.bf16.mxu1 %v4926_v26 }
 0x1c6   :  { %1779 = vmatpush1.bf16.msra.mxu0 %v3790_v58 }
 0x1c7   :  { %2250 = vmatpush1.bf16.msra.mxu1 %v3615_v49  ;;  %1780 = vmatprep.subr.bf16.mxu0 %v3796_v59  ;;  %v4937_v49 = vld [vmem:[#allocation17_spill] sm:$0xff] }
 0x1c8   :  { %2251 = vmatprep.subr.bf16.mxu1 %v4926_v26 }
 0x1ca   :  { %1781 = vmatpush1.bf16.msra.mxu0 %v3802_v63 }
 0x1cb   :  { %2252 = vmatpush1.bf16.msra.mxu1 %v3620_v50  ;;  %1782 = vmatprep.subr.bf16.mxu0 %v3808_v0  ;;  %v4938_v50 = vld [vmem:[#allocation18_spill] sm:$0xff] }
 0x1cc   :  { %2253 = vmatprep.subr.bf16.mxu1 %v4926_v26 }
 0x1ce   :  { %1783 = vmatpush1.bf16.msra.mxu0 %v4932_v45 }
 0x1cf   :  { %2254 = vmatpush1.bf16.msra.mxu1 %v4933_v46  ;;  %1784 = vmatprep.subr.bf16.mxu0 %v4934_v47  ;;  %v4196_v46 = vld [vmem:[%s4851_s2 + $0x4] ss:$8 sps:$4 sm:$0xff]  }
 0x1d0   :  { %2255 = vmatprep.subr.bf16.mxu1 %v4926_v26 }
 0x1d2   :  { %1785 = vmatpush1.bf16.msra.mxu0 %v4935_v10 }
 0x1d3   :  { %2256 = vmatpush1.bf16.msra.mxu1 %v4936_v48  ;;  %1786 = vmatprep.subr.bf16.mxu0 %v4937_v49  ;;  %v4949_v48 = vld [vmem:[#allocation26_spill] sm:$0xff] }
 0x1d4   :  { %2257 = vmatprep.subr.bf16.mxu1 %v4926_v26 }
 0x1d6   :  { %1787 = vmatpush1.bf16.msra.mxu0 %v4938_v50 }
 0x1d7   :  { %2258 = vmatpush1.bf16.msra.mxu1 %v4939_v15  ;;  %1788 = vmatprep.subr.bf16.mxu0 %v4940_v36  ;;  %v4204_v15 = vld [vmem:[%s4851_s2] ss:$8 sps:$4 sm:$0xff]  }
 0x1d8   :  { %2259 = vmatprep.subr.bf16.mxu1 %v4926_v26 }
 0x1da   :  { %1789 = vmatpush1.bf16.msra.mxu0 %v4941_v9 }
 0x1db   :  { %2260 = vmatpush1.bf16.msra.mxu1 %v4942_v11  ;;  %1790 = vmatprep.subr.bf16.mxu0 %v4943_v23 }
 0x1dc   :  { %2261 = vmatprep.subr.bf16.mxu1 %v4926_v26 }
 0x1de   :  { %1791 = vmatpush1.bf16.msra.mxu0 %v4944_v44 }
 0x1df   :  { %2262 = vmatpush1.bf16.msra.mxu1 %v4945_v22  ;;  %1792 = vmatprep.subr.bf16.mxu0 %v4946_v25  ;;  %v4236_v22 = vld [vmem:[%s4851_s2 + $0x20] ss:$8 sps:$4 sm:$0xff]  }
 0x1e0   :  { %2333 = vmatprep.subr.bf16.mxu1 %v3212_v4 }
 0x1e2   :  { %2272 = vmatmul.mubr.bf16.vlgmr.msra.gmra.mrb[16].mxu1 %v4184_v16  ;;  %1793 = vmatpush1.bf16.msra.mxu0 %v4947_v2 }
 0x1e3   :  { %2334 = vmatpush1.bf16.msra.mxu1 %v3691_v12  ;;  %1794 = vmatprep.subr.bf16.mxu0 %v4948_v6  ;;  %v4211_v12 = vld [vmem:[%s4851_s2 + $0x14] ss:$8 sps:$4 sm:$0xff]  }
 0x1e4   :  { %2335 = vmatprep.subr.bf16.mxu1 %v3698_v14  ;;  %2365 = vmatprep.mubr.bf16.mxu1 %v4003_v5  ;;  %v4950_v14 = vld [vmem:[#allocation8_spill] sm:$0xff]  ;;  %v4951_v5 = vld [vmem:[#allocation7_spill] sm:$0xff] }
 0x1e5   :  { %v4952_v11 = vpack.c.bf16 %v4950_v14, %v4951_v5  ;;  %v4380_v14 = vld [vmem:[%s4851_s2 + $0xc0] ss:$8 sps:$4 sm:$0xff]  }
 0x1e6   :  { %1795 = vmatpush1.bf16.msra.mxu0 %v4949_v48 }
 0x1e7   :  { %2336 = vmatpush1.bf16.msra.mxu1 %v3709_v20  ;;  %1967 = vmatprep.subr.bf16.mxu0 %v4196_v46  ;;  %v4222_v20 = vld [vmem:[%s4851_s2 + $0x10] ss:$8 sps:$4 sm:$0xff]  }
 0x1e8   :  { %2337 = vmatprep.subr.bf16.mxu1 %v3715_v21  ;;  %v4229_v21 = vld [vmem:[%s4851_s2 + $0x24] ss:$8 sps:$4 sm:$0xff]  }
 0x1e9   :  { %1797 = vmatmul.mubr.bf16.vlgmr.msra.gmra.mrb[28].mxu0 %v4952_v11  ;;  %v4398_v11 = vld [vmem:[%s4851_s2 + $0xd0] ss:$8 sps:$4 sm:$0xff]  }
 0x1ea   :  { %1968 = vmatpush1.bf16.msra.mxu0 %v4204_v15  ;;  %1999 = vmatprep.mubr.bf16.mxu0 %v4953_v34  ;;  %v4429_v34 = vld [vmem:[%s4851_s2 + $0xf0] ss:$8 sps:$4 sm:$0xff]  }
 0x1eb   :  { %2338 = vmatpush1.bf16.msra.mxu1 %v3722_v29  ;;  %1969 = vmatprep.subr.bf16.mxu0 %v4211_v12  ;;  %v4243_v29 = vld [vmem:[%s4851_s2 + $0x34] ss:$8 sps:$4 sm:$0xff]  }
 0x1ec   :  { %2339 = vmatprep.subr.bf16.mxu1 %v3728_v32  ;;  %v4250_v32 = vld [vmem:[%s4851_s2 + $0x30] ss:$8 sps:$4 sm:$0xff]  }
 0x1ee   :  { %1970 = vmatpush1.bf16.msra.mxu0 %v4222_v20 }
 0x1ef   :  { %2340 = vmatpush1.bf16.msra.mxu1 %v3736_v40  ;;  %1971 = vmatprep.subr.bf16.mxu0 %v4229_v21  ;;  %v4257_v40 = vld [vmem:[%s4851_s2 + $0x44] ss:$8 sps:$4 sm:$0xff]  }
 0x1f0   :  { %2341 = vmatprep.subr.bf16.mxu1 %v3742_v43  ;;  %v4264_v43 = vld [vmem:[%s4851_s2 + $0x40] ss:$8 sps:$4 sm:$0xff]  }
 0x1f2   :  { %1972 = vmatpush1.bf16.msra.mxu0 %v4236_v22 }
 0x1f3   :  { %2342 = vmatpush1.bf16.msra.mxu1 %v3753_v51  ;;  %1973 = vmatprep.subr.bf16.mxu0 %v4243_v29  ;;  %v4271_v51 = vld [vmem:[%s4851_s2 + $0x54] ss:$8 sps:$4 sm:$0xff]  }
 0x1f4   :  { %2343 = vmatprep.subr.bf16.mxu1 %v3759_v52  ;;  %v4278_v52 = vld [vmem:[%s4851_s2 + $0x50] ss:$8 sps:$4 sm:$0xff]  }
 0x1f6   :  { %1974 = vmatpush1.bf16.msra.mxu0 %v4250_v32 }
 0x1f7   :  { %2344 = vmatpush1.bf16.msra.mxu1 %v3766_v53  ;;  %1975 = vmatprep.subr.bf16.mxu0 %v4257_v40  ;;  %v4285_v53 = vld [vmem:[%s4851_s2 + $0x64] ss:$8 sps:$4 sm:$0xff]  }
 0x1f8   :  { %2345 = vmatprep.subr.bf16.mxu1 %v3772_v55  ;;  %v4292_v55 = vld [vmem:[%s4851_s2 + $0x60] ss:$8 sps:$4 sm:$0xff]  }
 0x1fa   :  { %1976 = vmatpush1.bf16.msra.mxu0 %v4264_v43 }
 0x1fb   :  { %2346 = vmatpush1.bf16.msra.mxu1 %v3778_v56  ;;  %1977 = vmatprep.subr.bf16.mxu0 %v4271_v51  ;;  %v4299_v56 = vld [vmem:[%s4851_s2 + $0x74] ss:$8 sps:$4 sm:$0xff]  }
 0x1fc   :  { %2347 = vmatprep.subr.bf16.mxu1 %v3784_v57  ;;  %v4306_v57 = vld [vmem:[%s4851_s2 + $0x70] ss:$8 sps:$4 sm:$0xff]  }
 0x1fe   :  { %1978 = vmatpush1.bf16.msra.mxu0 %v4278_v52 }
 0x1ff   :  { %2348 = vmatpush1.bf16.msra.mxu1 %v3790_v58  ;;  %1979 = vmatprep.subr.bf16.mxu0 %v4285_v53  ;;  %v4313_v58 = vld [vmem:[%s4851_s2 + $0x84] ss:$8 sps:$4 sm:$0xff]  }
 0x200   :  { %2349 = vmatprep.subr.bf16.mxu1 %v3796_v59  ;;  %v4320_v59 = vld [vmem:[%s4851_s2 + $0x80] ss:$8 sps:$4 sm:$0xff]  }
 0x202   :  { %1980 = vmatpush1.bf16.msra.mxu0 %v4292_v55 }
 0x203   :  { %2350 = vmatpush1.bf16.msra.mxu1 %v3802_v63  ;;  %1981 = vmatprep.subr.bf16.mxu0 %v4299_v56  ;;  %v4327_v63 = vld [vmem:[%s4851_s2 + $0x94] ss:$8 sps:$4 sm:$0xff]  }
 0x204   :  { %2351 = vmatprep.subr.bf16.mxu1 %v3808_v0  ;;  %v4334_v0 = vld [vmem:[%s4851_s2 + $0x90] ss:$8 sps:$4 sm:$0xff]  }
 0x206   :  { %1982 = vmatpush1.bf16.msra.mxu0 %v4306_v57 }
 0x207   :  { %2352 = vmatpush1.bf16.msra.mxu1 %v4932_v45  ;;  %1983 = vmatprep.subr.bf16.mxu0 %v4313_v58  ;;  %v4341_v45 = vld [vmem:[%s4851_s2 + $0xa4] ss:$8 sps:$4 sm:$0xff]  }
 0x208   :  { %2353 = vmatprep.subr.bf16.mxu1 %v4934_v47  ;;  %v4348_v47 = vld [vmem:[%s4851_s2 + $0xa0] ss:$8 sps:$4 sm:$0xff]  }
 0x20a   :  { %1984 = vmatpush1.bf16.msra.mxu0 %v4320_v59 }
 0x20b   :  { %2354 = vmatpush1.bf16.msra.mxu1 %v4935_v10  ;;  %1985 = vmatprep.subr.bf16.mxu0 %v4327_v63  ;;  %v4355_v10 = vld [vmem:[%s4851_s2 + $0xb4] ss:$8 sps:$4 sm:$0xff]  }
 0x20c   :  { %2355 = vmatprep.subr.bf16.mxu1 %v4937_v49  ;;  %v4362_v49 = vld [vmem:[%s4851_s2 + $0xb0] ss:$8 sps:$4 sm:$0xff]  }
 0x20e   :  { %1986 = vmatpush1.bf16.msra.mxu0 %v4334_v0 }
 0x20f   :  { %2356 = vmatpush1.bf16.msra.mxu1 %v4938_v50  ;;  %1987 = vmatprep.subr.bf16.mxu0 %v4341_v45  ;;  %v4369_v50 = vld [vmem:[%s4851_s2 + $0xc4] ss:$8 sps:$4 sm:$0xff]  }
 0x210   :  { %2357 = vmatprep.subr.bf16.mxu1 %v4940_v36 }
 0x212   :  { %1988 = vmatpush1.bf16.msra.mxu0 %v4348_v47 }
 0x213   :  { %2358 = vmatpush1.bf16.msra.mxu1 %v4941_v9  ;;  %1989 = vmatprep.subr.bf16.mxu0 %v4355_v10 }
 0x214   :  { %2359 = vmatprep.subr.bf16.mxu1 %v4943_v23  ;;  %v4389_v23 = vld [vmem:[%s4851_s2 + $0xd4] ss:$8 sps:$4 sm:$0xff]  }
 0x215   :  { %v4372_v4 = vpop.f32.mrb[12].mxu1 }
 0x216   :  { %v4374_v36 = vpop.f32.mrb[13].mxu1  ;;  %1990 = vmatpush1.bf16.msra.mxu0 %v4362_v49  ;;  %vm1663_vm11 = vcmp.ge.f32.partialorder %v4372_v4, 0.0 }
 0x217   :  { %2360 = vmatpush1.bf16.msra.mxu1 %v4944_v44  ;;  %v4383_v9 = vpop.f32.mrb[14].mxu1  ;;  %1991 = vmatprep.subr.bf16.mxu0 %v4369_v50  ;;  %v4405_v44 = vld [vmem:[%s4851_s2 + $0xe4] ss:$8 sps:$4 sm:$0xff]  }
 0x218   :  { %v4391_v5 = vpop.f32.mrb[15].mxu1  ;;  %2361 = vmatprep.subr.bf16.mxu1 %v4946_v25  ;;  %v4412_v25 = vld [vmem:[%s4851_s2 + $0xe0] ss:$8 sps:$4 sm:$0xff]   ;;  %vm1665_vm13 = vcmp.ge.f32.partialorder %v4383_v9, 0.0 }
 0x219   :  { %vm1666_vm14 = vcmp.ge.f32.partialorder %v4391_v5, 0.0 }
 0x21a   :  { %1992 = vmatpush1.bf16.msra.mxu0 %v4380_v14 }
 0x21b   :  { %2362 = vmatpush1.bf16.msra.mxu1 %v4947_v2  ;;  %1993 = vmatprep.subr.bf16.mxu0 %v4389_v23  ;;  %v4420_v2 = vld [vmem:[%s4851_s2 + $0xf4] ss:$8 sps:$4 sm:$0xff]  }
 0x21c   :  { %2363 = vmatprep.subr.bf16.mxu1 %v4948_v6  ;;  %v4954_v6 = vpack.c.bf16 %v3994_v24, %v3986_v17  ;;  %v4440_v17 = vld [vmem:[%s4851_s2 + $0x204] ss:$8 sps:$4 sm:$0xff]   ;;  %v4956_v24 = vld [vmem:[#allocation10_spill] sm:$0xff] }
 0x21e   :  { %1994 = vmatpush1.bf16.msra.mxu0 %v4398_v11 }
 0x21f   :  { %2364 = vmatpush1.bf16.msra.mxu1 %v4949_v48  ;;  %1995 = vmatprep.subr.bf16.mxu0 %v4405_v44  ;;  %v4955_v48 = vld [vmem:[#allocation11_spill] sm:$0xff] }
 0x220   :  { %2376 = vmatprep.subr.bf16.mxu1 %v4196_v46  ;;  %v4448_v46 = vld [vmem:[%s4851_s2 + $0x200] ss:$8 sps:$4 sm:$0xff]  }
 0x222   :  { %2366 = vmatmul.mubr.bf16.vlgmr.msra.gmra.mrb[20].mxu1 %v4954_v6  ;;  %1996 = vmatpush1.bf16.msra.mxu0 %v4412_v25  ;;  %v4661_v6 = vld [vmem:[%s4851_s2 + $0x2f0] ss:$8 sps:$4 sm:$0xff]  }
 0x223   :  { %2377 = vmatpush1.bf16.msra.mxu1 %v4204_v15  ;;  %2408 = vmatprep.mubr.bf16.mxu1 %v4955_v48  ;;  %v4456_v15 = vld [vmem:[%s4851_s2 + $0x214] ss:$8 sps:$4 sm:$0xff]  }
 0x224   :  { %1997 = vmatprep.subr.bf16.mxu0 %v4420_v2  ;;  %2378 = vmatprep.subr.bf16.mxu1 %v4211_v12  ;;  %v4463_v12 = vld [vmem:[%s4851_s2 + $0x210] ss:$8 sps:$4 sm:$0xff]  }
 0x226   :  { %1998 = vmatpush1.bf16.msra.mxu0 %v4429_v34 }
 0x227   :  { %2379 = vmatpush1.bf16.msra.mxu1 %v4222_v20  ;;  %2179 = vmatprep.subr.bf16.mxu0 %v4440_v17  ;;  %v4470_v20 = vld [vmem:[%s4851_s2 + $0x224] ss:$8 sps:$4 sm:$0xff]  }
 0x228   :  { %2380 = vmatprep.subr.bf16.mxu1 %v4229_v21  ;;  %v4477_v21 = vld [vmem:[%s4851_s2 + $0x220] ss:$8 sps:$4 sm:$0xff]  }
 0x229   :  { %2000 = vmatmul.mubr.bf16.vlgmr.msra.gmra.mrb[28].mxu0 %v4956_v24  ;;  %v4964_v24 = vld [vmem:[#allocation32_spill] sm:$0xff] }
 0x22a   :  { %2180 = vmatpush1.bf16.msra.mxu0 %v4448_v46  ;;  %2211 = vmatprep.mubr.bf16.mxu0 %v4955_v48 }
 0x22b   :  { %2381 = vmatpush1.bf16.msra.mxu1 %v4236_v22  ;;  %2181 = vmatprep.subr.bf16.mxu0 %v4456_v15  ;;  %v4484_v22 = vld [vmem:[%s4851_s2 + $0x234] ss:$8 sps:$4 sm:$0xff]  }
 0x22c   :  { %2382 = vmatprep.subr.bf16.mxu1 %v4243_v29  ;;  %v4491_v29 = vld [vmem:[%s4851_s2 + $0x230] ss:$8 sps:$4 sm:$0xff]  }
 0x22e   :  { %2182 = vmatpush1.bf16.msra.mxu0 %v4463_v12 }
 0x22f   :  { %2383 = vmatpush1.bf16.msra.mxu1 %v4250_v32  ;;  %2183 = vmatprep.subr.bf16.mxu0 %v4470_v20  ;;  %v4498_v32 = vld [vmem:[%s4851_s2 + $0x244] ss:$8 sps:$4 sm:$0xff]  }
 0x230   :  { %2384 = vmatprep.subr.bf16.mxu1 %v4257_v40  ;;  %v4505_v40 = vld [vmem:[%s4851_s2 + $0x240] ss:$8 sps:$4 sm:$0xff]  }
 0x232   :  { %2184 = vmatpush1.bf16.msra.mxu0 %v4477_v21 }
 0x233   :  { %2385 = vmatpush1.bf16.msra.mxu1 %v4264_v43  ;;  %2185 = vmatprep.subr.bf16.mxu0 %v4484_v22  ;;  %v4512_v43 = vld [vmem:[%s4851_s2 + $0x254] ss:$8 sps:$4 sm:$0xff]  }
 0x234   :  { %2386 = vmatprep.subr.bf16.mxu1 %v4271_v51  ;;  %v4519_v51 = vld [vmem:[%s4851_s2 + $0x250] ss:$8 sps:$4 sm:$0xff]  }
 0x236   :  { %2186 = vmatpush1.bf16.msra.mxu0 %v4491_v29 }
 0x237   :  { %2387 = vmatpush1.bf16.msra.mxu1 %v4278_v52  ;;  %2187 = vmatprep.subr.bf16.mxu0 %v4498_v32  ;;  %v4526_v52 = vld [vmem:[%s4851_s2 + $0x264] ss:$8 sps:$4 sm:$0xff]  }
 0x238   :  { %2388 = vmatprep.subr.bf16.mxu1 %v4285_v53  ;;  %v4533_v53 = vld [vmem:[%s4851_s2 + $0x260] ss:$8 sps:$4 sm:$0xff]  }
 0x23a   :  { %2188 = vmatpush1.bf16.msra.mxu0 %v4505_v40 }
 0x23b   :  { %2389 = vmatpush1.bf16.msra.mxu1 %v4292_v55  ;;  %2189 = vmatprep.subr.bf16.mxu0 %v4512_v43  ;;  %v4540_v55 = vld [vmem:[%s4851_s2 + $0x274] ss:$8 sps:$4 sm:$0xff]  }
 0x23c   :  { %2390 = vmatprep.subr.bf16.mxu1 %v4299_v56  ;;  %v4547_v56 = vld [vmem:[%s4851_s2 + $0x270] ss:$8 sps:$4 sm:$0xff]  }
 0x23e   :  { %2190 = vmatpush1.bf16.msra.mxu0 %v4519_v51 }
 0x23f   :  { %2391 = vmatpush1.bf16.msra.mxu1 %v4306_v57  ;;  %2191 = vmatprep.subr.bf16.mxu0 %v4526_v52  ;;  %v4554_v57 = vld [vmem:[%s4851_s2 + $0x284] ss:$8 sps:$4 sm:$0xff]  }
 0x240   :  { %2392 = vmatprep.subr.bf16.mxu1 %v4313_v58  ;;  %v4561_v58 = vld [vmem:[%s4851_s2 + $0x280] ss:$8 sps:$4 sm:$0xff]  }
 0x242   :  { %2192 = vmatpush1.bf16.msra.mxu0 %v4533_v53 }
 0x243   :  { %2393 = vmatpush1.bf16.msra.mxu1 %v4320_v59  ;;  %2193 = vmatprep.subr.bf16.mxu0 %v4540_v55  ;;  %v4568_v59 = vld [vmem:[%s4851_s2 + $0x294] ss:$8 sps:$4 sm:$0xff]  }
 0x244   :  { %2394 = vmatprep.subr.bf16.mxu1 %v4327_v63  ;;  %v4575_v63 = vld [vmem:[%s4851_s2 + $0x290] ss:$8 sps:$4 sm:$0xff]  }
 0x246   :  { %2194 = vmatpush1.bf16.msra.mxu0 %v4547_v56 }
 0x247   :  { %2395 = vmatpush1.bf16.msra.mxu1 %v4334_v0  ;;  %2195 = vmatprep.subr.bf16.mxu0 %v4554_v57  ;;  %v4582_v0 = vld [vmem:[%s4851_s2 + $0x2a4] ss:$8 sps:$4 sm:$0xff]  }
 0x248   :  { %2396 = vmatprep.subr.bf16.mxu1 %v4341_v45  ;;  %v4589_v45 = vld [vmem:[%s4851_s2 + $0x2a0] ss:$8 sps:$4 sm:$0xff]  }
 0x24a   :  { %2196 = vmatpush1.bf16.msra.mxu0 %v4561_v58 }
 0x24b   :  { %2397 = vmatpush1.bf16.msra.mxu1 %v4348_v47  ;;  %2197 = vmatprep.subr.bf16.mxu0 %v4568_v59  ;;  %v4596_v47 = vld [vmem:[%s4851_s2 + $0x2b4] ss:$8 sps:$4 sm:$0xff]  }
 0x24c   :  { %2398 = vmatprep.subr.bf16.mxu1 %v4355_v10  ;;  %v4603_v10 = vld [vmem:[%s4851_s2 + $0x2b0] ss:$8 sps:$4 sm:$0xff]  }
 0x24e   :  { %2198 = vmatpush1.bf16.msra.mxu0 %v4575_v63 }
 0x24f   :  { %2399 = vmatpush1.bf16.msra.mxu1 %v4362_v49  ;;  %2199 = vmatprep.subr.bf16.mxu0 %v4582_v0  ;;  %v4610_v49 = vld [vmem:[%s4851_s2 + $0x2c4] ss:$8 sps:$4 sm:$0xff]  }
 0x250   :  { %2400 = vmatprep.subr.bf16.mxu1 %v4369_v50  ;;  %v4617_v50 = vld [vmem:[%s4851_s2 + $0x2c0] ss:$8 sps:$4 sm:$0xff]  }
 0x252   :  { %2200 = vmatpush1.bf16.msra.mxu0 %v4589_v45 }
 0x253   :  { %2401 = vmatpush1.bf16.msra.mxu1 %v4380_v14  ;;  %2201 = vmatprep.subr.bf16.mxu0 %v4596_v47  ;;  %v4624_v14 = vld [vmem:[%s4851_s2 + $0x2d4] ss:$8 sps:$4 sm:$0xff]  }
 0x254   :  { %2402 = vmatprep.subr.bf16.mxu1 %v4389_v23  ;;  %v4631_v23 = vld [vmem:[%s4851_s2 + $0x2d0] ss:$8 sps:$4 sm:$0xff]  }
 0x256   :  { %2202 = vmatpush1.bf16.msra.mxu0 %v4603_v10 }
 0x257   :  { %2403 = vmatpush1.bf16.msra.mxu1 %v4398_v11  ;;  %2203 = vmatprep.subr.bf16.mxu0 %v4610_v49  ;;  %v4638_v11 = vld [vmem:[%s4851_s2 + $0x2e4] ss:$8 sps:$4 sm:$0xff]  }
 0x258   :  { %2404 = vmatprep.subr.bf16.mxu1 %v4405_v44  ;;  %v4957_v44 = vld [vmem:[#allocation13_spill] sm:$0xff] }
 0x25a   :  { %2204 = vmatpush1.bf16.msra.mxu0 %v4617_v50 }
 0x25b   :  { %2405 = vmatpush1.bf16.msra.mxu1 %v4412_v25  ;;  %2205 = vmatprep.subr.bf16.mxu0 %v4624_v14  ;;  %v4646_v25 = vld [vmem:[%s4851_s2 + $0x2e0] ss:$8 sps:$4 sm:$0xff]  }
 0x25c   :  { %2406 = vmatprep.subr.bf16.mxu1 %v4420_v2  ;;  %v4654_v2 = vld [vmem:[%s4851_s2 + $0x2f4] ss:$8 sps:$4 sm:$0xff]  }
 0x25e   :  { %2206 = vmatpush1.bf16.msra.mxu0 %v4631_v23 }
 0x25f   :  { %2407 = vmatpush1.bf16.msra.mxu1 %v4429_v34  ;;  %2207 = vmatprep.subr.bf16.mxu0 %v4638_v11  ;;  %v4958_v34 = vld [vmem:[#allocation27_spill] sm:$0xff] }
 0x260   :  { %2516 = vmatprep.subr.bf16.mxu1 %v4440_v17 }
 0x262   :  { %2409 = vmatmul.mubr.bf16.vlgmr.msra.gmra.mrb[20].mxu1 %v4957_v44  ;;  %2208 = vmatpush1.bf16.msra.mxu0 %v4646_v25 }
 0x263   :  { %2517 = vmatpush1.bf16.msra.mxu1 %v4448_v46  ;;  %2548 = vmatprep.mubr.bf16.mxu1 %v4090_v8  ;;  %v2426_v8 = vpop.permute.xlu1 %2425 }
 0x264   :  { %2209 = vmatprep.subr.bf16.mxu0 %v4654_v2  ;;  %2518 = vmatprep.subr.bf16.mxu1 %v4456_v15 }
 0x266   :  { %2210 = vmatpush1.bf16.msra.mxu0 %v4661_v6 }
 0x267   :  { %2519 = vmatpush1.bf16.msra.mxu1 %v4463_v12  ;;  %2432 = vmatprep.subr.bf16.mxu0 %v4926_v26 }
 0x268   :  { %2520 = vmatprep.subr.bf16.mxu1 %v4470_v20 }
 0x269   :  { %2212 = vmatmul.mubr.bf16.vlgmr.msra.gmra.mrb[28].mxu0 %v4957_v44  ;;  %v2294_v44 = vld [vmem:[%s4853_s4 + $0x3] sm:$0x3] }
 0x26a   :  { %2433 = vmatpush1.bf16.msra.mxu0 %v4958_v34  ;;  %2909 = vmatprep.mubr.msk.bf16.mxu0 %vm1419_vm12, %v2426_v8 }
 0x26b   :  { %2521 = vmatpush1.bf16.msra.mxu1 %v4477_v21  ;;  %2434 = vmatprep.subr.bf16.mxu0 %v4926_v26 }
 0x26c   :  { %2522 = vmatprep.subr.bf16.mxu1 %v4484_v22 }
 0x26e   :  { %2435 = vmatpush1.bf16.msra.mxu0 %v3903_v31 }
 0x26f   :  { %2523 = vmatpush1.bf16.msra.mxu1 %v4491_v29  ;;  %2436 = vmatprep.subr.bf16.mxu0 %v4926_v26 }
 0x270   :  { %2524 = vmatprep.subr.bf16.mxu1 %v4498_v32 }
 0x272   :  { %2437 = vmatpush1.bf16.msra.mxu0 %v3910_v35 }
 0x273   :  { %2525 = vmatpush1.bf16.msra.mxu1 %v4505_v40  ;;  %2438 = vmatprep.subr.bf16.mxu0 %v4926_v26 }
 0x274   :  { %2526 = vmatprep.subr.bf16.mxu1 %v4512_v43 }
 0x276   :  { %2439 = vmatpush1.bf16.msra.mxu0 %v3917_v60 }
 0x277   :  { %2527 = vmatpush1.bf16.msra.mxu1 %v4519_v51  ;;  %2440 = vmatprep.subr.bf16.mxu0 %v4926_v26 }
 0x278   :  { %2528 = vmatprep.subr.bf16.mxu1 %v4526_v52 }
 0x27a   :  { %2441 = vmatpush1.bf16.msra.mxu0 %v3924_v61  ;;  %v2424_v61 = vpop.permute.xlu0 %2423 }
 0x27b   :  { %2529 = vmatpush1.bf16.msra.mxu1 %v4533_v53  ;;  %2442 = vmatprep.subr.bf16.mxu0 %v4926_v26  ;;  %v3245_v53 = vld [vmem:[%s4852_s3 + $0xc0] sm:$0xff]  }
 0x27c   :  { %v4688_v31 = vpop.f32.mrb[24].mxu0  ;;  %2530 = vmatprep.subr.bf16.mxu1 %v4540_v55  ;;  %v3250_v55 = vld [vmem:[%s4852_s3 + $0xe8] sm:$0xff]  }
 0x27d   :  { %v1658_v35 = vpop.f32.mrb[25].mxu0  ;;  %vm1691_vm7 = vcmp.ge.f32.partialorder %v4688_v31, 0.0 }
 0x27e   :  { %v4691_v48 = vpop.f32.mrb[26].mxu0  ;;  %2443 = vmatpush1.bf16.msra.mxu0 %v3931_v62  ;;  %v2427_v62 = vsel %vm1419_vm12, %v2424_v61, %v2426_v8  ;;  %v1670_v8 = vmul.f32 0.2, %v4391_v5 }
 0x27f   :  { %2531 = vmatpush1.bf16.msra.mxu1 %v4547_v56  ;;  %v1661_v60 = vpop.f32.mrb[27].mxu0  ;;  %2444 = vmatprep.subr.bf16.mxu0 %v4926_v26  ;;  %vm1692_vm8 = vcmp.ge.f32.partialorder %v4691_v48, 0.0  ;;  %v3251_v56 = vld [vmem:[%s4852_s3 + $0xf0] sm:$0xff]  }
 0x280   :  { %2532 = vmatprep.subr.bf16.mxu1 %v4554_v57  ;;  %v3252_v57 = vld [vmem:[%s4852_s3 + $0xf8] sm:$0xff]  }
 0x282   :  { %2445 = vmatpush1.bf16.msra.mxu0 %v3938_v37  ;;  %v4960_v37 = vld [vmem:[#allocation28_spill] sm:$0xff] }
 0x283   :  { %2533 = vmatpush1.bf16.msra.mxu1 %v4561_v58  ;;  %2446 = vmatprep.subr.bf16.mxu0 %v4926_v26  ;;  %v3253_v58 = vld [vmem:[%s4852_s3 + $0x100] sm:$0xff]  }
 0x284   :  { %2534 = vmatprep.subr.bf16.mxu1 %v4568_v59  ;;  %v3254_v59 = vld [vmem:[%s4852_s3 + $0x108] sm:$0xff]  }
 0x286   :  { %2447 = vmatpush1.bf16.msra.mxu0 %v3945_v38  ;;  %v4961_v38 = vld [vmem:[#allocation29_spill] sm:$0xff] }
 0x287   :  { %2535 = vmatpush1.bf16.msra.mxu1 %v4575_v63  ;;  %2448 = vmatprep.subr.bf16.mxu0 %v4926_v26  ;;  %v3255_v63 = vld [vmem:[%s4852_s3 + $0x110] sm:$0xff]  }
 0x288   :  { %2536 = vmatprep.subr.bf16.mxu1 %v4582_v0  ;;  %v2568_v0 = vpop.permute.xlu0 %2567 }
 0x28a   :  { %2449 = vmatpush1.bf16.msra.mxu0 %v3952_v39  ;;  %v4962_v39 = vld [vmem:[#allocation30_spill] sm:$0xff] }
 0x28b   :  { %2537 = vmatpush1.bf16.msra.mxu1 %v4589_v45  ;;  %2450 = vmatprep.subr.bf16.mxu0 %v4926_v26  ;;  %v3256_v45 = vld [vmem:[%s4852_s3 + $0x118] sm:$0xff]  }
 0x28c   :  { %2538 = vmatprep.subr.bf16.mxu1 %v4596_v47 }
 0x28e   :  { %2451 = vmatpush1.bf16.msra.mxu0 %v3959_v41  ;;  %v1693_v41 = vmul.f32 0.2, %v4688_v31 }
 0x28f   :  { %2539 = vmatpush1.bf16.msra.mxu1 %v4603_v10  ;;  %2452 = vmatprep.subr.bf16.mxu0 %v4926_v26  ;;  %v1677_v10 = vlaneseq }
 0x290   :  { %2540 = vmatprep.subr.bf16.mxu1 %v4610_v49 }
 0x291   :  { %v1678_v49 = vshrl.u32 %v1677_v10, 7 }
 0x292   :  { %2453 = vmatpush1.bf16.msra.mxu0 %v3966_v42  ;;  %v2860_v42 = vld [vmem:[%s4853_s4 + $0x2] ss:$0 sm:$0xff] }
 0x293   :  { %2541 = vmatpush1.bf16.msra.mxu1 %v4617_v50  ;;  %2454 = vmatprep.subr.bf16.mxu0 %v4926_v26  ;;  %v1679_v50 = vsub.s32 0, %v1678_v49 }
 0x294   :  { %2542 = vmatprep.subr.bf16.mxu1 %v4624_v14  ;;  %v1667_v14 = vmul.f32 0.2, %v4372_v4 }
 0x295   :  { %v2299_v35 = vrot.slane %v2294_v44, %v1679_v50 }
 0x296   :  { %2455 = vmatpush1.bf16.msra.mxu0 %v3973_v27  ;;  %v4959_v27 = vpack.c.bf16 %v3999_v7, %v3980_v19  ;;  %v4963_v7 = vld [vmem:[#allocation31_spill] sm:$0xff]  ;;  %v1694_v19 = vmul.f32 0.2, %v4691_v48 }
 0x297   :  { %2543 = vmatpush1.bf16.msra.mxu1 %v4631_v23  ;;  %2473 = vmatprep.subr.bf16.mxu0 %v4926_v26  ;;  %v1675_v23 = vld [vmem:[%s4853_s4] sm:$0x3] }
 0x298   :  { %2544 = vmatprep.subr.bf16.mxu1 %v4638_v11  ;;  %v1696_v15 = vsel %vm1692_vm8, %v4691_v48, %v1694_v19  ;;  %v1680_v11 = vrot.slane %v1675_v23, %v1679_v50 }
 0x299   :  { %2465 = vmatmul.mubr.bf16.vlgmr.msra.gmra.mrb[32].mxu0 %v2427_v62  ;;  %v1705_v40 = vmul.f32 %v2860_v42, %v1696_v15 }
 0x29a   :  { %2474 = vmatpush1.bf16.msra.mxu0 %v4009_v1  ;;  %2910 = vmatprep.mubr.msk.bf16.mxu0 %vm1419_vm12, %v4130_v18  ;;  %v2908_v18 = vld [vmem:[%s4853_s4 + $0x5] ss:$0 sm:$0xff] }
 0x29b   :  { %2545 = vmatpush1.bf16.msra.mxu1 %v4646_v25  ;;  %2475 = vmatprep.subr.bf16.mxu0 %v4926_v26  ;;  %v1671_v25 = vsel %vm1663_vm11, %v4372_v4, %v1667_v14 }
 0x29c   :  { %2546 = vmatprep.subr.bf16.mxu1 %v4654_v2  ;;  %v1668_v2 = vmul.f32 0.2, %v4374_v36  ;;  %v1687_v48 = vmul.f32 %v1680_v11, %v1671_v25  ;;  %v2912_v25 = vld [vmem:[%s4853_s4 + $0x8] ss:$0 sm:$0xff] }
 0x29e   :  { %2476 = vmatpush1.bf16.msra.mxu0 %v4022_v33  ;;  %v1695_v33 = vsel %vm1691_vm7, %v4688_v31, %v1693_v41 }
 0x29f   :  { %2547 = vmatpush1.bf16.msra.mxu1 %v4661_v6  ;;  %2477 = vmatprep.subr.bf16.mxu0 %v4926_v26  ;;  %v1704_v22 = vmul.f32 %v2860_v42, %v1695_v33  ;;  %v1669_v6 = vmul.f32 0.2, %v4383_v9 }
 0x2a2   :  { %2549 = vmatmul.mubr.bf16.vlgmr.msra.gmra.mrb[20].mxu1 %v4959_v27  ;;  %2478 = vmatpush1.bf16.msra.mxu0 %v4032_v54  ;;  %v1673_v27 = vsel %vm1665_vm13, %v4383_v9, %v1669_v6 }
 0x2a3   :  { %2479 = vmatprep.subr.bf16.mxu0 %v4926_v26 }
 0x2a6   :  { %2480 = vmatpush1.bf16.msra.mxu0 %v4960_v37 }
 0x2a7   :  { %2481 = vmatprep.subr.bf16.mxu0 %v4926_v26 }
 0x2aa   :  { %2482 = vmatpush1.bf16.msra.mxu0 %v4961_v38 }
 0x2ab   :  { %2483 = vmatprep.subr.bf16.mxu0 %v4926_v26 }
 0x2ae   :  { %2484 = vmatpush1.bf16.msra.mxu0 %v4962_v39  ;;  %v1674_v39 = vsel %vm1666_vm14, %v4391_v5, %v1670_v8 }
 0x2af   :  { %2485 = vmatprep.subr.bf16.mxu0 %v4926_v26 }
 0x2b2   :  { %2486 = vmatpush1.bf16.msra.mxu0 %v4963_v7 }
 0x2b3   :  { %2487 = vmatprep.subr.bf16.mxu0 %v4926_v26 }
 0x2b5   :  { %v2273_v1 = vpop.f32.mrb[16].mxu1 }
 0x2b6   :  { %vm2310_vm9 = vcmp.ge.f32.partialorder %v2273_v1, 0.0  ;;  %v2312_v54 = vmul.f32 0.2, %v2273_v1  ;;  %v2275_v17 = vpop.f32.mrb[17].mxu1  ;;  %2488 = vmatpush1.bf16.msra.mxu0 %v4964_v24  ;;  %v1689_v24 = vmul.f32 %v1680_v11, %v1673_v27 }
 0x2b7   :  { %v2276_v46 = vpop.f32.mrb[18].mxu1  ;;  %2489 = vmatprep.subr.bf16.mxu0 %v4926_v26 }
 0x2b8   :  { %v2314_v12 = vsel %vm2310_vm9, %v2273_v1, %v2312_v54  ;;  %vm2311_vm10 = vcmp.ge.f32.partialorder %v2276_v46, 0.0  ;;  %v2313_v20 = vmul.f32 0.2, %v2276_v46  ;;  %v2278_v21 = vpop.f32.mrb[19].mxu1 }
 0x2b9   :  { %v2323_v29 = vmul.f32 %v2908_v18, %v2314_v12 }
 0x2ba   :  { %v2315_v32 = vsel %vm2311_vm10, %v2276_v46, %v2313_v20  ;;  %2490 = vmatpush1.bf16.msra.mxu0 %v4086_v3  ;;  %v2570_v3 = vpop.permute.xlu1 %2569 }
 0x2bb   :  { %v2324_v43 = vmul.f32 %v2908_v18, %v2315_v32  ;;  %2491 = vmatprep.subr.bf16.mxu0 %v4926_v26  ;;  %v4760_v51 = vadd.f32 %v2323_v29, %v1704_v22  ;;  %v2571_v47 = vsel %vm1419_vm12, %v2568_v0, %v2570_v3  ;;  %v2631_v22 = vld [vmem:[%s4853_s4 + $0x6] sm:$0x3] }
 0x2bc   :  { %v2636_v32 = vrot.slane %v2631_v22, %v1679_v50 }
 0x2bd   :  { %v4762_v52 = vadd.f32 %v2324_v43, %v1705_v40 }
 0x2be   :  { %2492 = vmatpush1.bf16.msra.mxu0 %v4097_v13  ;;  %v3246_v13 = vld [vmem:[%s4852_s3 + $0xc8] sm:$0xff]  }
 0x2bf   :  { %2493 = vmatprep.subr.bf16.mxu0 %v4926_v26 }
 0x2c2   :  { %2494 = vmatpush1.bf16.msra.mxu0 %v4111_v30  ;;  %v3247_v30 = vld [vmem:[%s4852_s3 + $0xd0] sm:$0xff]  }
 0x2c3   :  { %2495 = vmatprep.subr.bf16.mxu0 %v4926_v26 }
 0x2c6   :  { %2496 = vmatpush1.bf16.msra.mxu0 %v4123_v28  ;;  %v3248_v28 = vld [vmem:[%s4852_s3 + $0xd8] sm:$0xff]  }
 0x2c7   :  { %2576 = vmatprep.subr.bf16.mxu0 %v4926_v26 }
 0x2c9   :  { %2506 = vmatmul.mubr.bf16.vlgmr.msra.gmra.mrb[32].mxu0 %v4184_v16  ;;  %v3249_v16 = vld [vmem:[%s4852_s3 + $0xe0] sm:$0xff]  }
 0x2ca   :  { %2577 = vmatpush1.bf16.msra.mxu0 %v3245_v53  ;;  %2911 = vmatprep.mubr.msk.bf16.mxu0 %vm1419_vm12, %v2570_v3  ;;  %vm1664_vm12 = vcmp.ge.f32.partialorder %v4374_v36, 0.0 }
 0x2cb   :  { %2578 = vmatprep.subr.bf16.mxu0 %v4926_v26  ;;  %v1672_v62 = vsel %vm1664_vm12, %v4374_v36, %v1668_v2 }
 0x2ce   :  { %2579 = vmatpush1.bf16.msra.mxu0 %v3246_v13 }
 0x2cf   :  { %2580 = vmatprep.subr.bf16.mxu0 %v4926_v26 }
 0x2d2   :  { %2581 = vmatpush1.bf16.msra.mxu0 %v3247_v30 }
 0x2d3   :  { %2582 = vmatprep.subr.bf16.mxu0 %v4926_v26 }
 0x2d6   :  { %2583 = vmatpush1.bf16.msra.mxu0 %v3248_v28 }
 0x2d7   :  { %2584 = vmatprep.subr.bf16.mxu0 %v4926_v26 }
 0x2da   :  { %2585 = vmatpush1.bf16.msra.mxu0 %v3249_v16 }
 0x2db   :  { %2586 = vmatprep.subr.bf16.mxu0 %v4926_v26 }
 0x2de   :  { %2587 = vmatpush1.bf16.msra.mxu0 %v3250_v55 }
 0x2df   :  { %2588 = vmatprep.subr.bf16.mxu0 %v4926_v26 }
 0x2e2   :  { %2589 = vmatpush1.bf16.msra.mxu0 %v3251_v56 }
 0x2e3   :  { %2590 = vmatprep.subr.bf16.mxu0 %v4926_v26 }
 0x2e6   :  { %2591 = vmatpush1.bf16.msra.mxu0 %v3252_v57 }
 0x2e7   :  { %2592 = vmatprep.subr.bf16.mxu0 %v4926_v26 }
 0x2ea   :  { %2593 = vmatpush1.bf16.msra.mxu0 %v3253_v58 }
 0x2eb   :  { %2594 = vmatprep.subr.bf16.mxu0 %v4926_v26 }
 0x2ee   :  { %2595 = vmatpush1.bf16.msra.mxu0 %v3254_v59 }
 0x2ef   :  { %2596 = vmatprep.subr.bf16.mxu0 %v4926_v26 }
 0x2f2   :  { %2597 = vmatpush1.bf16.msra.mxu0 %v3255_v63 }
 0x2f3   :  { %2598 = vmatprep.subr.bf16.mxu0 %v4926_v26  ;;  %v1683_v26 = vsub.s32 1, %v1678_v49 }
 0x2f5   :  { %v1684_v34 = vrot.slane %v1675_v23, %v1683_v26  ;;  %v2303_v4 = vrot.slane %v2294_v44, %v1683_v26  ;;  %v2640_v3 = vrot.slane %v2631_v22, %v1683_v26 }
 0x2f6   :  { %2599 = vmatpush1.bf16.msra.mxu0 %v3256_v45 }
 0x2f7   :  { %v1688_v54 = vmul.f32 %v1684_v34, %v1672_v62  ;;  %v1690_v15 = vmul.f32 %v1684_v34, %v1674_v39 }
 0x2f9   :  { %2609 = vmatmul.mubr.bf16.vlgmr.msra.gmra.mrb[32].mxu0 %v2571_v47 }
 0x33c   :  { %v2213_v31 = vpop.f32.mrb[28].mxu0 }
 0x33d   :  { %vm2282_vm15 = vcmp.ge.f32.partialorder %v2213_v31, 0.0  ;;  %v2286_v60 = vmul.f32 0.2, %v2213_v31  ;;  %v2215_v61 = vpop.f32.mrb[29].mxu0 }
 0x33e   :  { %vm2283_vm0 = vcmp.ge.f32.partialorder %v2215_v61, 0.0  ;;  %v2287_v37 = vmul.f32 0.2, %v2215_v61  ;;  %v2217_v38 = vpop.f32.mrb[30].mxu0 }
 0x33f   :  { %v2290_v41 = vsel %vm2282_vm15, %v2213_v31, %v2286_v60  ;;  %vm2284_vm1 = vcmp.ge.f32.partialorder %v2217_v38, 0.0  ;;  %v2288_v7 = vmul.f32 0.2, %v2217_v38  ;;  %v2219_v19 = vpop.f32.mrb[31].mxu0 }
 0x340   :  { %v2306_v42 = vmul.f32 %v2299_v35, %v2290_v41  ;;  %v2291_v1 = vsel %vm2283_vm0, %v2215_v61, %v2287_v37  ;;  %vm2285_vm2 = vcmp.ge.f32.partialorder %v2219_v19, 0.0  ;;  %v2289_v33 = vmul.f32 0.2, %v2219_v19 }
 0x341   :  { %v2307_v18 = vmul.f32 %v2303_v4, %v2291_v1  ;;  %v2292_v17 = vsel %vm2284_vm1, %v2217_v38, %v2288_v7 }
 0x342   :  { %v2325_v36 = vadd.f32 %v2306_v42, %v1687_v48  ;;  %v2308_v46 = vmul.f32 %v2299_v35, %v2292_v17  ;;  %v2293_v9 = vsel %vm2285_vm2, %v2219_v19, %v2289_v33 }
 0x343   :  { %v2326_v12 = vadd.f32 %v2307_v18, %v1688_v54  ;;  %v2309_v20 = vmul.f32 %v2303_v4, %v2293_v9 }
 0x344   :  { %v2327_v21 = vadd.f32 %v2308_v46, %v1689_v24 }
 0x345   :  { %v2328_v5 = vadd.f32 %v2309_v20, %v1690_v15 }
 0x375   :  { %v2550_v29 = vpop.f32.mrb[20].mxu1 }
 0x376   :  { %vm2619_vm3 = vcmp.ge.f32.partialorder %v2550_v29, 0.0  ;;  %v2623_v40 = vmul.f32 0.2, %v2550_v29  ;;  %v2552_v43 = vpop.f32.mrb[21].mxu1 }
 0x377   :  { %vm2620_vm4 = vcmp.ge.f32.partialorder %v2552_v43, 0.0  ;;  %v2624_v53 = vmul.f32 0.2, %v2552_v43  ;;  %v2554_v13 = vpop.f32.mrb[22].mxu1 }
 0x378   :  { %v2627_v30 = vsel %vm2619_vm3, %v2550_v29, %v2623_v40  ;;  %vm2621_vm5 = vcmp.ge.f32.partialorder %v2554_v13, 0.0  ;;  %v2625_v28 = vmul.f32 0.2, %v2554_v13  ;;  %v2556_v16 = vpop.f32.mrb[23].mxu1 }
 0x379   :  { %v2643_v55 = vmul.f32 %v2636_v32, %v2627_v30  ;;  %v2628_v56 = vsel %vm2620_vm4, %v2552_v43, %v2624_v53  ;;  %vm2622_vm6 = vcmp.ge.f32.partialorder %v2556_v16, 0.0  ;;  %v2626_v57 = vmul.f32 0.2, %v2556_v16 }
 0x37a   :  { %v2644_v58 = vmul.f32 %v2640_v3, %v2628_v56  ;;  %v2629_v59 = vsel %vm2621_vm5, %v2554_v13, %v2625_v28 }
 0x37b   :  { %v2662_v63 = vadd.f32 %v2643_v55, %v2325_v36  ;;  %v2645_v0 = vmul.f32 %v2636_v32, %v2629_v59  ;;  %v2630_v45 = vsel %vm2622_vm6, %v2556_v16, %v2626_v57 }
 0x37c   :  { %v2663_v47 = vadd.f32 %v2644_v58, %v2326_v12  ;;  %v2646_v10 = vmul.f32 %v2640_v3, %v2630_v45 }
 0x37d   :  { %v2664_v49 = vadd.f32 %v2645_v0, %v2327_v21 }
 0x37e   :  { %v2665_v50 = vadd.f32 %v2646_v10, %v2328_v5  ;;  %v2668_v14 = vadd.f32 %v2663_v47, %v2662_v63 }
 0x380   :  { %v2669_v23 = vadd.f32 %v2668_v14, %v2664_v49 }
 0x382   :  { %v2670_v26 = vadd.f32 %v2669_v23, %v2665_v50 }
 0x384   :  { %2671 = vadd.xlane.f32.xlu0 %v2670_v26 }
 0x3cc   :  { %v2610_v11 = vpop.f32.mrb[32].mxu0 }
 0x3cd   :  { %vm2647_vm7 = vcmp.ge.f32.partialorder %v2610_v11, 0.0  ;;  %v2649_v44 = vmul.f32 0.2, %v2610_v11  ;;  %v2612_v2 = vpop.f32.mrb[33].mxu0 }
 0x3ce   :  { %v2613_v6 = vpop.f32.mrb[34].mxu0 }
 0x3cf   :  { %v2651_v8 = vsel %vm2647_vm7, %v2610_v11, %v2649_v44  ;;  %vm2648_vm8 = vcmp.ge.f32.partialorder %v2613_v6, 0.0  ;;  %v2650_v34 = vmul.f32 0.2, %v2613_v6  ;;  %v2615_v31 = vpop.f32.mrb[35].mxu0 }
 0x3d0   :  { %v2660_v35 = vmul.f32 %v2912_v25, %v2651_v8 }
 0x3d1   :  { %v2652_v48 = vsel %vm2648_vm8, %v2613_v6, %v2650_v34 }
 0x3d2   :  { %v2661_v60 = vmul.f32 %v2912_v25, %v2652_v48  ;;  %v2666_v61 = vadd.f32 %v2660_v35, %v4760_v51 }
 0x3d4   :  { %v2667_v4 = vadd.f32 %v2661_v60, %v4762_v52 }
 0x3d6   :  { %v2680_v62 = vadd.f32 %v2667_v4, %v2666_v61 }
 0x3d8   :  { %2681 = vadd.xlane.f32.xlu1 %v2680_v62 }
 0x411   :  { %v2672_v27 = vpop.xlane.xlu0 %2671 }
 0x412   :  { %v2673_v37 = vrot.slane %v2672_v27, 4 }
 0x414   :  { %v2674_v38 = vadd.f32 %v2673_v37, %v2672_v27 }
 0x416   :  { %v2675_v39 = vrot.slane %v2674_v38, 2 }
 0x418   :  { %v2676_v41 = vadd.f32 %v2675_v39, %v2674_v38 }
 0x41a   :  { %v2677_v7 = vrot.slane %v2676_v41, 1 }
 0x41c   :  { %v2678_v19 = vadd.f32 %v2677_v7, %v2676_v41 }
 0x41e   :  { %2953 = vpush %v2678_v19 }
 0x44f   :  { %s2954_s4 = spop %2953 }
 0x465   :  { %v2682_v42 = vpop.xlane.xlu1 %2681 }
 0x466   :  { %v2683_v1 = vrot.slane %v2682_v42, 4 }
 0x468   :  { %v2684_v33 = vadd.f32 %v2683_v1, %v2682_v42 }
 0x46a   :  { %v2685_v54 = vrot.slane %v2684_v33, 2 }
 0x46c   :  { %v2686_v18 = vadd.f32 %v2685_v54, %v2684_v33 }
 0x46e   :  { %v2687_v17 = vrot.slane %v2686_v18, 1 }
 0x470   :  { %v2688_v24 = vadd.f32 %v2687_v17, %v2686_v18 }
 0x472   :  { %2955 = vpush %v2688_v24 }
 0x4a3   :  { %s2956_s23 = spop %2955 }
 0x4a4   :  { %s2690_s24 = sadd.f32 %s2956_s23, %s2954_s4 }
 0x4a6   :  { %v2691_v51 = vstv %s2690_s24 }
 0x4a7   :  { %2692 = vst [vmem:[%s4854_s5] sm:$0xff] %v2691_v51 }

</bundles_post_ra>
